<compile_context>
chip_gen: v7x
topology: tpu7x:2x2x1
jax: 0.10.0
libtpu: 0.0.40
codegen_flags: <defaults>
</compile_context>

<pallas_src>
import functools

import jax
import jax.numpy as jnp
from jax.experimental import pallas as pl
from jax.experimental.pallas import tpu as pltpu


# ----------------------------------------------------------------------------
# Shared in-kernel LSTM cell helpers
# ----------------------------------------------------------------------------
def _gate_consts(H):
    # sigmoid(z) = 0.5*tanh(z/2) + 0.5 for the i/f/o slices, plain tanh for g.
    half = jnp.full((1, H), 0.5, jnp.float32)
    one = jnp.ones((1, H), jnp.float32)
    zero = jnp.zeros((1, H), jnp.float32)
    pre = jnp.concatenate([half, half, one, half], axis=1)       # == post_mul
    post_add = jnp.concatenate([half, half, zero, half], axis=1)
    return pre, post_add


def _lstm_cell(g, c, H, pre, post_add):
    # ONE tanh over the full [B, 4H] gate vector (EUP), then a cheap VPU affine.
    act = jnp.tanh(g * pre) * pre + post_add
    i_g = act[:, 0:H]
    f_g = act[:, H:2 * H]
    g_g = act[:, 2 * H:3 * H]
    o_g = act[:, 3 * H:4 * H]
    c_new = f_g * c + i_g * g_g
    h_new = o_g * jnp.tanh(c_new)
    return h_new, c_new


# ----------------------------------------------------------------------------
# Pallas kernel 1: coarse bidirectional LSTM over the sentence (B = 1).
#   x_ref     : [T, E]      bf16 (embedded tokens; wrapper drops the B=1 dim)
#   wih_ref   : [E, 8H]     bf16 (fwd 4H ++ bwd 4H, pre-transposed)
#   whh_f/b   : [H, 4H]     bf16 (pre-transposed)
#   b_ref     : [1, 8H]     f32  (bias_ih + bias_hh, fwd ++ bwd)
#   out_ref   : [T, 2H]     f32  (fwd in [:, :H], bwd in [:, H:]) single store
# ----------------------------------------------------------------------------
def _coarse_bilstm_kernel(x_ref, wih_ref, whh_f_ref, whh_b_ref, b_ref, out_ref,
                          *, hidden, seq_len):
    H, T = hidden, seq_len
    x = x_ref[...]                                               # [T, E]
    # Both directions' input projections in ONE MXU call.
    gx = jnp.dot(x, wih_ref[...],
                 preferred_element_type=jnp.float32) + b_ref[...]   # [T, 8H] f32
    whh_f = whh_f_ref[...]
    whh_b = whh_b_ref[...]
    pre, post_add = _gate_consts(H)

    h_f = jnp.zeros((1, H), jnp.float32)
    c_f = jnp.zeros((1, H), jnp.float32)
    h_b = jnp.zeros((1, H), jnp.float32)
    c_b = jnp.zeros((1, H), jnp.float32)
    hs_f, hs_b = [], []
    for step in range(T):              # static unroll; fwd/bwd interleaved
        tf, tb = step, T - 1 - step
        g_f = gx[tf:tf + 1, 0:4 * H] + jnp.dot(
            h_f.astype(whh_f.dtype), whh_f, preferred_element_type=jnp.float32)
        g_b = gx[tb:tb + 1, 4 * H:8 * H] + jnp.dot(
            h_b.astype(whh_b.dtype), whh_b, preferred_element_type=jnp.float32)
        h_f, c_f = _lstm_cell(g_f, c_f, H, pre, post_add)
        h_b, c_b = _lstm_cell(g_b, c_b, H, pre, post_add)
        hs_f.append(h_f)
        hs_b.append(h_b)
    hs_b.reverse()                     # back to time order

    # Single lane-dense store of the whole output (no per-step masked stores).
    out = jnp.concatenate([jnp.concatenate(hs_f, axis=0),
                           jnp.concatenate(hs_b, axis=0)], axis=1)   # [T, 2H]
    out_ref[...] = out.astype(out_ref.dtype)


def coarse_bilstm(x, p):
    """x: [T, E] f32 -> lstm_out [T, 2H] f32."""
    T, _ = x.shape
    H = p["whh_f"].shape[0]
    vmem = pl.BlockSpec(memory_space=pltpu.MemorySpace.VMEM)
    kernel = functools.partial(_coarse_bilstm_kernel, hidden=H, seq_len=T)
    return pl.pallas_call(
        kernel,
        out_shape=jax.ShapeDtypeStruct((T, 2 * H), jnp.float32),
        in_specs=[vmem] * 5,
        out_specs=vmem,
    )(x.astype(jnp.bfloat16), p["wih_cat"], p["whh_f"], p["whh_b"], p["b_cat"])


# ----------------------------------------------------------------------------
# Pallas kernel 2: fused fine path.
#   All segment batches (no/one/two hole) are padded to L_max and stacked into
#   a single time-major batch. One kernel runs the disc_rnn BiLSTM (masked for
#   padding), then ReLU -> Linear(2H -> 2) -> per-group weighted CE, summed
#   over groups. The final hidden states never leave vregs/VMEM.
#   x_ref    : [L, N, 2Hf] bf16   mask_ref : [L, N, 1] f32 (1 real / 0 pad)
#   wih_ref  : [2Hf, 8Hd] bf16    whh_f/b  : [Hd, 4Hd] bf16   b_ref: [1, 8Hd]
#   wcls_ref : [2Hd, 2] bf16      bcls_ref : [1, 2] f32
#   y_ref    : [N, 1] int32       cw_ref   : [1, 2] f32 (class weights)
#   grp_ref  : [N, G] f32 one-hot branch id
#   loss_ref : [1, 1] f32
# ----------------------------------------------------------------------------
def _fine_disc_cls_kernel(x_ref, mask_ref, wih_ref, whh_f_ref, whh_b_ref, b_ref,
                          wcls_ref, bcls_ref, y_ref, cw_ref, grp_ref, loss_ref,
                          *, hidden, max_len):
    H, L = hidden, max_len
    wih = wih_ref[...]
    b = b_ref[...]
    whh_f = whh_f_ref[...]
    whh_b = whh_b_ref[...]
    pre, post_add = _gate_consts(H)

    # Input projection per timestep, both directions fused in one MXU call.
    gx = [jnp.dot(x_ref[t], wih, preferred_element_type=jnp.float32) + b
          for t in range(L)]                                     # each [N, 8H]
    N = gx[0].shape[0]

    h_f = jnp.zeros((N, H), jnp.float32)
    c_f = jnp.zeros((N, H), jnp.float32)
    h_b = jnp.zeros((N, H), jnp.float32)
    c_b = jnp.zeros((N, H), jnp.float32)
    for step in range(L):              # fwd processes t, bwd processes L-1-t
        tf, tb = step, L - 1 - step
        m_f = mask_ref[tf]             # [N, 1]
        m_b = mask_ref[tb]
        g_f = gx[tf][:, 0:4 * H] + jnp.dot(
            h_f.astype(whh_f.dtype), whh_f, preferred_element_type=jnp.float32)
        g_b = gx[tb][:, 4 * H:8 * H] + jnp.dot(
            h_b.astype(whh_b.dtype), whh_b, preferred_element_type=jnp.float32)
        hf_n, cf_n = _lstm_cell(g_f, c_f, H, pre, post_add)
        hb_n, cb_n = _lstm_cell(g_b, c_b, H, pre, post_add)
        # Freeze state on padded timesteps -> exact-length PyTorch semantics.
        h_f = m_f * hf_n + (1.0 - m_f) * h_f
        c_f = m_f * cf_n + (1.0 - m_f) * c_f
        h_b = m_b * hb_n + (1.0 - m_b) * h_b
        c_b = m_b * cb_n + (1.0 - m_b) * c_b

    # Classifier head fused in-kernel: relu(cat(ht[0], ht[1])) @ Wcls + b.
    wcls = wcls_ref[...]
    feat = jnp.maximum(jnp.concatenate([h_f, h_b], axis=1), 0.0)     # [N, 2H]
    logits = jnp.dot(feat.astype(wcls.dtype), wcls,
                     preferred_element_type=jnp.float32) + bcls_ref[...]  # [N, 2]

    # Weighted cross-entropy (PyTorch mean = sum(w*nll)/sum(w)) per branch
    # group, then summed over groups (== three separate CE losses added).
    Nn, C = logits.shape
    m = jnp.max(logits, axis=1, keepdims=True)                       # [N, 1]
    lse = m + jnp.log(jnp.sum(jnp.exp(logits - m), axis=1, keepdims=True))
    cls_iota = jax.lax.broadcasted_iota(jnp.int32, (Nn, C), 1)
    onehot = (cls_iota == y_ref[...]).astype(jnp.float32)            # [N, C]
    picked = jnp.sum(logits * onehot, axis=1, keepdims=True)         # [N, 1]
    wy = jnp.sum(cw_ref[...] * onehot, axis=1, keepdims=True)        # [N, 1]
    wnll = wy * (lse - picked)                                       # [N, 1]
    grp = grp_ref[...]                                               # [N, G]
    num = jnp.sum(grp * wnll, axis=0, keepdims=True)                 # [1, G]
    den = jnp.sum(grp * wy, axis=0, keepdims=True)                   # [1, G]
    loss_ref[0, 0] = jnp.sum(num / den)


def fine_fused_loss(x_tm, mask_tm, y, grp, disc_p, w_cls, b_cls, class_w):
    L, N, _ = x_tm.shape
    H = disc_p["whh_f"].shape[0]
    vmem = pl.BlockSpec(memory_space=pltpu.MemorySpace.VMEM)
    kernel = functools.partial(_fine_disc_cls_kernel, hidden=H, max_len=L)
    # TODO(synk): for large N on v7x, add a grid over N with
    # dimension_semantics=("parallel",) and a per-tile partial-loss reduction;
    # at N=9 a single invocation is cheaper than the extra grid machinery.
    loss = pl.pallas_call(
        kernel,
        out_shape=jax.ShapeDtypeStruct((1, 1), jnp.float32),
        in_specs=[vmem] * 11,
        out_specs=vmem,
    )(x_tm.astype(jnp.bfloat16), mask_tm.astype(jnp.float32),
      disc_p["wih_cat"], disc_p["whh_f"], disc_p["whh_b"], disc_p["b_cat"],
      w_cls, b_cls, y.reshape(-1, 1).astype(jnp.int32), class_w, grp)
    return loss[0, 0]


# ----------------------------------------------------------------------------
# Parameter init (PyTorch-style uniform(-1/sqrt(H), 1/sqrt(H))), then layout
# plumbing: transpose to [in, out], concat fwd/bwd input projections, cast the
# MXU operands to bf16 (biases stay f32).
# ----------------------------------------------------------------------------
def init_bilstm_params(key, E, H, mxu_dtype=jnp.bfloat16):
    ks = jax.random.split(key, 8)
    s = 1.0 / (H ** 0.5)
    u = lambda k, shp: jax.random.uniform(k, shp, jnp.float32, -s, s)
    wih_f = u(ks[0], (4 * H, E))
    whh_f = u(ks[1], (4 * H, H))
    b_f = u(ks[2], (1, 4 * H)) + u(ks[3], (1, 4 * H))
    wih_b = u(ks[4], (4 * H, E))
    whh_b = u(ks[5], (4 * H, H))
    b_b = u(ks[6], (1, 4 * H)) + u(ks[7], (1, 4 * H))
    return dict(
        wih_cat=jnp.concatenate([wih_f.T, wih_b.T], axis=1).astype(mxu_dtype),  # [E, 8H]
        whh_f=whh_f.T.astype(mxu_dtype),                                        # [H, 4H]
        whh_b=whh_b.T.astype(mxu_dtype),
        b_cat=jnp.concatenate([b_f, b_b], axis=1),                              # [1, 8H] f32
    )


# ----------------------------------------------------------------------------
# SemiEnt forward
# ----------------------------------------------------------------------------
def semient_forward(params, token_vec, span_cache, sample_vars):
    # ---- forward_coarse ----
    word_vec = jnp.take(params["word_embed"], token_vec, axis=0)    # [T, E]
    # LockedDropout(input_dropout) is identity in eval mode.
    feat2hyper = coarse_bilstm(word_vec, params["rnn"])[None]       # [1, T, 2Hf]
    # TODO(synk): Hypergraph(config) is not defined in the provided source; its
    # semi-CRF coarse loss over feat2hyper cannot be reproduced, so the coarse
    # loss term is omitted (feat2hyper is still computed by the Pallas kernel).
    coarse_loss = jnp.float32(0.0)

    # ---- forward_fine: batch all branches into ONE fused kernel call ----
    segs = []                                        # list of (x [Ni, Li, 2Hf], y [Ni])
    (no_x1, no_x2), no_y = sample_vars[0]
    segs.append((span_cache[no_x1, no_x2, 0, :][:, None, :], no_y))
    (o_x1, o_x2, o_x3, o_x4), o_y = sample_vars[1]
    segs.append((jnp.stack([span_cache[o_x1, o_x2, 0, :],
                            span_cache[o_x3, o_x4, 0, :]], axis=1), o_y))
    if sample_vars[2] is not None:
        (t_x1, t_x2, t_x3, t_x4, t_x5, t_x6), t_y = sample_vars[2]
        segs.append((jnp.stack([span_cache[t_x1, t_x2, 0, :],
                                span_cache[t_x3, t_x4, 0, :],
                                span_cache[t_x5, t_x6, 0, :]], axis=1), t_y))

    n_groups = len(segs)
    L_max = max(s.shape[1] for s, _ in segs)
    xs, masks, ys, grps = [], [], [], []
    for g, (s, y) in enumerate(segs):
        Ni, Li, _ = s.shape
        xs.append(jnp.pad(s, ((0, 0), (0, L_max - Li), (0, 0))))
        valid = (jnp.arange(L_max) < Li).astype(jnp.float32)         # [L_max]
        masks.append(jnp.broadcast_to(valid[None, :], (Ni, L_max)))
        ys.append(y)
        grps.append(jax.nn.one_hot(jnp.full((Ni,), g, jnp.int32),
                                   n_groups, dtype=jnp.float32))
    x_all = jnp.concatenate(xs, axis=0)                              # [N, L_max, 2Hf]
    x_tm = jnp.transpose(x_all, (1, 0, 2))                           # [L_max, N, 2Hf]
    mask_tm = jnp.transpose(jnp.concatenate(masks, axis=0))[:, :, None]  # [L_max, N, 1]
    y_all = jnp.concatenate(ys, axis=0)
    grp_all = jnp.concatenate(grps, axis=0)                          # [N, G]

    # d_dropout is identity in eval mode.
    fine_loss = fine_fused_loss(x_tm, mask_tm, y_all, grp_all,
                                params["disc_rnn"], params["w_cls"],
                                params["b_cls"], params["class_w"])
    return coarse_loss + fine_loss, feat2hyper


if __name__ == "__main__":
    # Small synthetic config. H = 64 so gate vectors are 4H = 256 full lanes
    # and the coarse output last dim 2H = 128 is lane-dense.
    voc_size, token_embed = 50, 32
    f_hidden, d_hidden = 64, 64
    T = 12
    class_weight = 2.0

    key = jax.random.PRNGKey(0)
    ks = jax.random.split(key, 6)

    w_cls_pt = 0.1 * jax.random.normal(ks[3], (2, 2 * d_hidden), jnp.float32)
    params = dict(
        word_embed=0.1 * jax.random.normal(ks[0], (voc_size, token_embed), jnp.float32),
        rnn=init_bilstm_params(ks[1], token_embed, f_hidden),
        disc_rnn=init_bilstm_params(ks[2], 2 * f_hidden, d_hidden),
        w_cls=w_cls_pt.T.astype(jnp.bfloat16),        # [2Hd, 2], pre-transposed
        b_cls=jnp.zeros((1, 2), jnp.float32),
        class_w=jnp.array([[1.0, class_weight]], jnp.float32),
    )

    token_vec = jax.random.randint(ks[4], (T,), 0, voc_size)
    # span_cache stands in for hypergraph.span_cache: [T, T, 1, 2*f_hidden]
    span_cache = 0.1 * jax.random.normal(ks[5], (T, T, 1, 2 * f_hidden), jnp.float32)

    # sample_vars: (no_hole, one_hole, two_hole)
    no_hole = ((jnp.array([0, 2, 4, 6]), jnp.array([1, 3, 5, 8])),
               jnp.array([1, 0, 1, 0]))
    one_hole = ((jnp.array([0, 1, 3]), jnp.array([1, 2, 4]),
                 jnp.array([4, 5, 7]), jnp.array([5, 6, 9])),
                jnp.array([0, 1, 1]))
    two_hole = ((jnp.array([0, 1]), jnp.array([1, 2]),
                 jnp.array([4, 5]), jnp.array([5, 6]),
                 jnp.array([8, 9]), jnp.array([9, 10])),
                jnp.array([1, 0]))
    sample_vars = (no_hole, one_hole, two_hole)

    loss, feat2hyper = semient_forward(params, token_vec, span_cache, sample_vars)
    jax.block_until_ready((loss, feat2hyper))
    print("KERNEL_OK")
</pallas_src>

<mosaic_0001>
module attributes {stable_mosaic.version = 11 : i64} {
  func.func @_coarse_bilstm_kernel(%arg0: memref<12x32xbf16, #tpu.memory_space<vmem>>, %arg1: memref<32x512xbf16, #tpu.memory_space<vmem>>, %arg2: memref<64x256xbf16, #tpu.memory_space<vmem>>, %arg3: memref<64x256xbf16, #tpu.memory_space<vmem>>, %arg4: memref<1x512xf32, #tpu.memory_space<vmem>>, %arg5: memref<12x128xf32, #tpu.memory_space<vmem>>) attributes {dimension_semantics = [], scalar_prefetch = 0 : i64, scratch_operands = 0 : i64, tpu.core_type = #tpu.core_type<tc>} {
    %c0 = arith.constant 0 : index
    %c0_0 = arith.constant 0 : index
    %0 = vector.load %arg0[%c0, %c0_0] : memref<12x32xbf16, #tpu.memory_space<vmem>>, vector<12x32xbf16>
    %c0_1 = arith.constant 0 : index
    %c0_2 = arith.constant 0 : index
    %1 = vector.load %arg1[%c0_1, %c0_2] : memref<32x512xbf16, #tpu.memory_space<vmem>>, vector<32x512xbf16>
    %cst = arith.constant dense<0.000000e+00> : vector<12x512xf32>
    %2 = tpu.matmul %0, %1, %cst {dimension_numbers = #tpu.dot_dimension_numbers<[1], [0], [0], [1], [0, 0, 1, 1], [], []>} : vector<12x32xbf16>, vector<32x512xbf16>, vector<12x512xf32> -> vector<12x512xf32>
    %c0_3 = arith.constant 0 : index
    %c0_4 = arith.constant 0 : index
    %3 = vector.load %arg4[%c0_3, %c0_4] : memref<1x512xf32, #tpu.memory_space<vmem>>, vector<1x512xf32>
    %4 = vector.broadcast %3 : vector<1x512xf32> to vector<12x512xf32>
    %5 = arith.addf %2, %4 : vector<12x512xf32>
    %c0_5 = arith.constant 0 : index
    %c0_6 = arith.constant 0 : index
    %6 = vector.load %arg2[%c0_5, %c0_6] : memref<64x256xbf16, #tpu.memory_space<vmem>>, vector<64x256xbf16>
    %c0_7 = arith.constant 0 : index
    %c0_8 = arith.constant 0 : index
    %7 = vector.load %arg3[%c0_7, %c0_8] : memref<64x256xbf16, #tpu.memory_space<vmem>>, vector<64x256xbf16>
    %cst_9 = arith.constant 5.000000e-01 : f32
    %8 = vector.broadcast %cst_9 : f32 to vector<1x64xf32>
    %cst_10 = arith.constant 1.000000e+00 : f32
    %9 = vector.broadcast %cst_10 : f32 to vector<1x64xf32>
    %cst_11 = arith.constant 0.000000e+00 : f32
    %10 = vector.broadcast %cst_11 : f32 to vector<1x64xf32>
    %11 = tpu.concatenate %8, %8, %9, %8 in 1 : vector<1x64xf32>, vector<1x64xf32>, vector<1x64xf32>, vector<1x64xf32> -> vector<1x256xf32>
    %12 = tpu.concatenate %8, %8, %10, %8 in 1 : vector<1x64xf32>, vector<1x64xf32>, vector<1x64xf32>, vector<1x64xf32> -> vector<1x256xf32>
    %cst_12 = arith.constant 0.000000e+00 : f32
    %13 = vector.broadcast %cst_12 : f32 to vector<1x64xf32>
    %cst_13 = arith.constant 0.000000e+00 : f32
    %14 = vector.broadcast %cst_13 : f32 to vector<1x64xf32>
    %cst_14 = arith.constant 0.000000e+00 : f32
    %15 = vector.broadcast %cst_14 : f32 to vector<1x64xf32>
    %cst_15 = arith.constant 0.000000e+00 : f32
    %16 = vector.broadcast %cst_15 : f32 to vector<1x64xf32>
    %17 = vector.extract_strided_slice %5 {offsets = [0, 0], sizes = [1, 256], strides = [1, 1]} : vector<12x512xf32> to vector<1x256xf32>
    %18 = arith.truncf %13 : vector<1x64xf32> to vector<1x64xbf16>
    %cst_16 = arith.constant dense<0.000000e+00> : vector<1x256xf32>
    %19 = tpu.matmul %18, %6, %cst_16 {dimension_numbers = #tpu.dot_dimension_numbers<[1], [0], [0], [1], [0, 0, 1, 1], [], []>} : vector<1x64xbf16>, vector<64x256xbf16>, vector<1x256xf32> -> vector<1x256xf32>
    %20 = arith.addf %17, %19 : vector<1x256xf32>
    %21 = vector.extract_strided_slice %5 {offsets = [11, 256], sizes = [1, 256], strides = [1, 1]} : vector<12x512xf32> to vector<1x256xf32>
    %22 = arith.truncf %15 : vector<1x64xf32> to vector<1x64xbf16>
    %cst_17 = arith.constant dense<0.000000e+00> : vector<1x256xf32>
    %23 = tpu.matmul %22, %7, %cst_17 {dimension_numbers = #tpu.dot_dimension_numbers<[1], [0], [0], [1], [0, 0, 1, 1], [], []>} : vector<1x64xbf16>, vector<64x256xbf16>, vector<1x256xf32> -> vector<1x256xf32>
    %24 = arith.addf %21, %23 : vector<1x256xf32>
    %25 = arith.mulf %20, %11 : vector<1x256xf32>
    %26 = math.tanh %25 : vector<1x256xf32>
    %27 = arith.mulf %26, %11 : vector<1x256xf32>
    %28 = arith.addf %27, %12 : vector<1x256xf32>
    %29 = vector.extract_strided_slice %28 {offsets = [0, 0], sizes = [1, 64], strides = [1, 1]} : vector<1x256xf32> to vector<1x64xf32>
    %30 = vector.extract_strided_slice %28 {offsets = [0, 64], sizes = [1, 64], strides = [1, 1]} : vector<1x256xf32> to vector<1x64xf32>
    %31 = vector.extract_strided_slice %28 {offsets = [0, 128], sizes = [1, 64], strides = [1, 1]} : vector<1x256xf32> to vector<1x64xf32>
    %32 = vector.extract_strided_slice %28 {offsets = [0, 192], sizes = [1, 64], strides = [1, 1]} : vector<1x256xf32> to vector<1x64xf32>
    %33 = arith.mulf %30, %14 : vector<1x64xf32>
    %34 = arith.mulf %29, %31 : vector<1x64xf32>
    %35 = arith.addf %33, %34 : vector<1x64xf32>
    %36 = math.tanh %35 : vector<1x64xf32>
    %37 = arith.mulf %32, %36 : vector<1x64xf32>
    %38 = arith.mulf %24, %11 : vector<1x256xf32>
    %39 = math.tanh %38 : vector<1x256xf32>
    %40 = arith.mulf %39, %11 : vector<1x256xf32>
    %41 = arith.addf %40, %12 : vector<1x256xf32>
    %42 = vector.extract_strided_slice %41 {offsets = [0, 0], sizes = [1, 64], strides = [1, 1]} : vector<1x256xf32> to vector<1x64xf32>
    %43 = vector.extract_strided_slice %41 {offsets = [0, 64], sizes = [1, 64], strides = [1, 1]} : vector<1x256xf32> to vector<1x64xf32>
    %44 = vector.extract_strided_slice %41 {offsets = [0, 128], sizes = [1, 64], strides = [1, 1]} : vector<1x256xf32> to vector<1x64xf32>
    %45 = vector.extract_strided_slice %41 {offsets = [0, 192], sizes = [1, 64], strides = [1, 1]} : vector<1x256xf32> to vector<1x64xf32>
    %46 = arith.mulf %43, %16 : vector<1x64xf32>
    %47 = arith.mulf %42, %44 : vector<1x64xf32>
    %48 = arith.addf %46, %47 : vector<1x64xf32>
    %49 = math.tanh %48 : vector<1x64xf32>
    %50 = arith.mulf %45, %49 : vector<1x64xf32>
    %51 = vector.extract_strided_slice %5 {offsets = [1, 0], sizes = [1, 256], strides = [1, 1]} : vector<12x512xf32> to vector<1x256xf32>
    %52 = arith.truncf %37 : vector<1x64xf32> to vector<1x64xbf16>
    %cst_18 = arith.constant dense<0.000000e+00> : vector<1x256xf32>
    %53 = tpu.matmul %52, %6, %cst_18 {dimension_numbers = #tpu.dot_dimension_numbers<[1], [0], [0], [1], [0, 0, 1, 1], [], []>} : vector<1x64xbf16>, vector<64x256xbf16>, vector<1x256xf32> -> vector<1x256xf32>
    %54 = arith.addf %51, %53 : vector<1x256xf32>
    %55 = vector.extract_strided_slice %5 {offsets = [10, 256], sizes = [1, 256], strides = [1, 1]} : vector<12x512xf32> to vector<1x256xf32>
    %56 = arith.truncf %50 : vector<1x64xf32> to vector<1x64xbf16>
    %cst_19 = arith.constant dense<0.000000e+00> : vector<1x256xf32>
    %57 = tpu.matmul %56, %7, %cst_19 {dimension_numbers = #tpu.dot_dimension_numbers<[1], [0], [0], [1], [0, 0, 1, 1], [], []>} : vector<1x64xbf16>, vector<64x256xbf16>, vector<1x256xf32> -> vector<1x256xf32>
    %58 = arith.addf %55, %57 : vector<1x256xf32>
    %59 = arith.mulf %54, %11 : vector<1x256xf32>
    %60 = math.tanh %59 : vector<1x256xf32>
    %61 = arith.mulf %60, %11 : vector<1x256xf32>
    %62 = arith.addf %61, %12 : vector<1x256xf32>
    %63 = vector.extract_strided_slice %62 {offsets = [0, 0], sizes = [1, 64], strides = [1, 1]} : vector<1x256xf32> to vector<1x64xf32>
    %64 = vector.extract_strided_slice %62 {offsets = [0, 64], sizes = [1, 64], strides = [1, 1]} : vector<1x256xf32> to vector<1x64xf32>
    %65 = vector.extract_strided_slice %62 {offsets = [0, 128], sizes = [1, 64], strides = [1, 1]} : vector<1x256xf32> to vector<1x64xf32>
    %66 = vector.extract_strided_slice %62 {offsets = [0, 192], sizes = [1, 64], strides = [1, 1]} : vector<1x256xf32> to vector<1x64xf32>
    %67 = arith.mulf %64, %35 : vector<1x64xf32>
    %68 = arith.mulf %63, %65 : vector<1x64xf32>
    %69 = arith.addf %67, %68 : vector<1x64xf32>
    %70 = math.tanh %69 : vector<1x64xf32>
    %71 = arith.mulf %66, %70 : vector<1x64xf32>
    %72 = arith.mulf %58, %11 : vector<1x256xf32>
    %73 = math.tanh %72 : vector<1x256xf32>
    %74 = arith.mulf %73, %11 : vector<1x256xf32>
    %75 = arith.addf %74, %12 : vector<1x256xf32>
    %76 = vector.extract_strided_slice %75 {offsets = [0, 0], sizes = [1, 64], strides = [1, 1]} : vector<1x256xf32> to vector<1x64xf32>
    %77 = vector.extract_strided_slice %75 {offsets = [0, 64], sizes = [1, 64], strides = [1, 1]} : vector<1x256xf32> to vector<1x64xf32>
    %78 = vector.extract_strided_slice %75 {offsets = [0, 128], sizes = [1, 64], strides = [1, 1]} : vector<1x256xf32> to vector<1x64xf32>
    %79 = vector.extract_strided_slice %75 {offsets = [0, 192], sizes = [1, 64], strides = [1, 1]} : vector<1x256xf32> to vector<1x64xf32>
    %80 = arith.mulf %77, %48 : vector<1x64xf32>
    %81 = arith.mulf %76, %78 : vector<1x64xf32>
    %82 = arith.addf %80, %81 : vector<1x64xf32>
    %83 = math.tanh %82 : vector<1x64xf32>
    %84 = arith.mulf %79, %83 : vector<1x64xf32>
    %85 = vector.extract_strided_slice %5 {offsets = [2, 0], sizes = [1, 256], strides = [1, 1]} : vector<12x512xf32> to vector<1x256xf32>
    %86 = arith.truncf %71 : vector<1x64xf32> to vector<1x64xbf16>
    %cst_20 = arith.constant dense<0.000000e+00> : vector<1x256xf32>
    %87 = tpu.matmul %86, %6, %cst_20 {dimension_numbers = #tpu.dot_dimension_numbers<[1], [0], [0], [1], [0, 0, 1, 1], [], []>} : vector<1x64xbf16>, vector<64x256xbf16>, vector<1x256xf32> -> vector<1x256xf32>
    %88 = arith.addf %85, %87 : vector<1x256xf32>
    %89 = vector.extract_strided_slice %5 {offsets = [9, 256], sizes = [1, 256], strides = [1, 1]} : vector<12x512xf32> to vector<1x256xf32>
    %90 = arith.truncf %84 : vector<1x64xf32> to vector<1x64xbf16>
    %cst_21 = arith.constant dense<0.000000e+00> : vector<1x256xf32>
    %91 = tpu.matmul %90, %7, %cst_21 {dimension_numbers = #tpu.dot_dimension_numbers<[1], [0], [0], [1], [0, 0, 1, 1], [], []>} : vector<1x64xbf16>, vector<64x256xbf16>, vector<1x256xf32> -> vector<1x256xf32>
    %92 = arith.addf %89, %91 : vector<1x256xf32>
    %93 = arith.mulf %88, %11 : vector<1x256xf32>
    %94 = math.tanh %93 : vector<1x256xf32>
    %95 = arith.mulf %94, %11 : vector<1x256xf32>
    %96 = arith.addf %95, %12 : vector<1x256xf32>
    %97 = vector.extract_strided_slice %96 {offsets = [0, 0], sizes = [1, 64], strides = [1, 1]} : vector<1x256xf32> to vector<1x64xf32>
    %98 = vector.extract_strided_slice %96 {offsets = [0, 64], sizes = [1, 64], strides = [1, 1]} : vector<1x256xf32> to vector<1x64xf32>
    %99 = vector.extract_strided_slice %96 {offsets = [0, 128], sizes = [1, 64], strides = [1, 1]} : vector<1x256xf32> to vector<1x64xf32>
    %100 = vector.extract_strided_slice %96 {offsets = [0, 192], sizes = [1, 64], strides = [1, 1]} : vector<1x256xf32> to vector<1x64xf32>
    %101 = arith.mulf %98, %69 : vector<1x64xf32>
    %102 = arith.mulf %97, %99 : vector<1x64xf32>
    %103 = arith.addf %101, %102 : vector<1x64xf32>
    %104 = math.tanh %103 : vector<1x64xf32>
    %105 = arith.mulf %100, %104 : vector<1x64xf32>
    %106 = arith.mulf %92, %11 : vector<1x256xf32>
    %107 = math.tanh %106 : vector<1x256xf32>
    %108 = arith.mulf %107, %11 : vector<1x256xf32>
    %109 = arith.addf %108, %12 : vector<1x256xf32>
    %110 = vector.extract_strided_slice %109 {offsets = [0, 0], sizes = [1, 64], strides = [1, 1]} : vector<1x256xf32> to vector<1x64xf32>
    %111 = vector.extract_strided_slice %109 {offsets = [0, 64], sizes = [1, 64], strides = [1, 1]} : vector<1x256xf32> to vector<1x64xf32>
    %112 = vector.extract_strided_slice %109 {offsets = [0, 128], sizes = [1, 64], strides = [1, 1]} : vector<1x256xf32> to vector<1x64xf32>
    %113 = vector.extract_strided_slice %109 {offsets = [0, 192], sizes = [1, 64], strides = [1, 1]} : vector<1x256xf32> to vector<1x64xf32>
    %114 = arith.mulf %111, %82 : vector<1x64xf32>
    %115 = arith.mulf %110, %112 : vector<1x64xf32>
    %116 = arith.addf %114, %115 : vector<1x64xf32>
    %117 = math.tanh %116 : vector<1x64xf32>
    %118 = arith.mulf %113, %117 : vector<1x64xf32>
    %119 = vector.extract_strided_slice %5 {offsets = [3, 0], sizes = [1, 256], strides = [1, 1]} : vector<12x512xf32> to vector<1x256xf32>
    %120 = arith.truncf %105 : vector<1x64xf32> to vector<1x64xbf16>
    %cst_22 = arith.constant dense<0.000000e+00> : vector<1x256xf32>
    %121 = tpu.matmul %120, %6, %cst_22 {dimension_numbers = #tpu.dot_dimension_numbers<[1], [0], [0], [1], [0, 0, 1, 1], [], []>} : vector<1x64xbf16>, vector<64x256xbf16>, vector<1x256xf32> -> vector<1x256xf32>
    %122 = arith.addf %119, %121 : vector<1x256xf32>
    %123 = vector.extract_strided_slice %5 {offsets = [8, 256], sizes = [1, 256], strides = [1, 1]} : vector<12x512xf32> to vector<1x256xf32>
    %124 = arith.truncf %118 : vector<1x64xf32> to vector<1x64xbf16>
    %cst_23 = arith.constant dense<0.000000e+00> : vector<1x256xf32>
    %125 = tpu.matmul %124, %7, %cst_23 {dimension_numbers = #tpu.dot_dimension_numbers<[1], [0], [0], [1], [0, 0, 1, 1], [], []>} : vector<1x64xbf16>, vector<64x256xbf16>, vector<1x256xf32> -> vector<1x256xf32>
    %126 = arith.addf %123, %125 : vector<1x256xf32>
    %127 = arith.mulf %122, %11 : vector<1x256xf32>
    %128 = math.tanh %127 : vector<1x256xf32>
    %129 = arith.mulf %128, %11 : vector<1x256xf32>
    %130 = arith.addf %129, %12 : vector<1x256xf32>
    %131 = vector.extract_strided_slice %130 {offsets = [0, 0], sizes = [1, 64], strides = [1, 1]} : vector<1x256xf32> to vector<1x64xf32>
    %132 = vector.extract_strided_slice %130 {offsets = [0, 64], sizes = [1, 64], strides = [1, 1]} : vector<1x256xf32> to vector<1x64xf32>
    %133 = vector.extract_strided_slice %130 {offsets = [0, 128], sizes = [1, 64], strides = [1, 1]} : vector<1x256xf32> to vector<1x64xf32>
    %134 = vector.extract_strided_slice %130 {offsets = [0, 192], sizes = [1, 64], strides = [1, 1]} : vector<1x256xf32> to vector<1x64xf32>
    %135 = arith.mulf %132, %103 : vector<1x64xf32>
    %136 = arith.mulf %131, %133 : vector<1x64xf32>
    %137 = arith.addf %135, %136 : vector<1x64xf32>
    %138 = math.tanh %137 : vector<1x64xf32>
    %139 = arith.mulf %134, %138 : vector<1x64xf32>
    %140 = arith.mulf %126, %11 : vector<1x256xf32>
    %141 = math.tanh %140 : vector<1x256xf32>
    %142 = arith.mulf %141, %11 : vector<1x256xf32>
    %143 = arith.addf %142, %12 : vector<1x256xf32>
    %144 = vector.extract_strided_slice %143 {offsets = [0, 0], sizes = [1, 64], strides = [1, 1]} : vector<1x256xf32> to vector<1x64xf32>
    %145 = vector.extract_strided_slice %143 {offsets = [0, 64], sizes = [1, 64], strides = [1, 1]} : vector<1x256xf32> to vector<1x64xf32>
    %146 = vector.extract_strided_slice %143 {offsets = [0, 128], sizes = [1, 64], strides = [1, 1]} : vector<1x256xf32> to vector<1x64xf32>
    %147 = vector.extract_strided_slice %143 {offsets = [0, 192], sizes = [1, 64], strides = [1, 1]} : vector<1x256xf32> to vector<1x64xf32>
    %148 = arith.mulf %145, %116 : vector<1x64xf32>
    %149 = arith.mulf %144, %146 : vector<1x64xf32>
    %150 = arith.addf %148, %149 : vector<1x64xf32>
    %151 = math.tanh %150 : vector<1x64xf32>
    %152 = arith.mulf %147, %151 : vector<1x64xf32>
    %153 = vector.extract_strided_slice %5 {offsets = [4, 0], sizes = [1, 256], strides = [1, 1]} : vector<12x512xf32> to vector<1x256xf32>
    %154 = arith.truncf %139 : vector<1x64xf32> to vector<1x64xbf16>
    %cst_24 = arith.constant dense<0.000000e+00> : vector<1x256xf32>
    %155 = tpu.matmul %154, %6, %cst_24 {dimension_numbers = #tpu.dot_dimension_numbers<[1], [0], [0], [1], [0, 0, 1, 1], [], []>} : vector<1x64xbf16>, vector<64x256xbf16>, vector<1x256xf32> -> vector<1x256xf32>
    %156 = arith.addf %153, %155 : vector<1x256xf32>
    %157 = vector.extract_strided_slice %5 {offsets = [7, 256], sizes = [1, 256], strides = [1, 1]} : vector<12x512xf32> to vector<1x256xf32>
    %158 = arith.truncf %152 : vector<1x64xf32> to vector<1x64xbf16>
    %cst_25 = arith.constant dense<0.000000e+00> : vector<1x256xf32>
    %159 = tpu.matmul %158, %7, %cst_25 {dimension_numbers = #tpu.dot_dimension_numbers<[1], [0], [0], [1], [0, 0, 1, 1], [], []>} : vector<1x64xbf16>, vector<64x256xbf16>, vector<1x256xf32> -> vector<1x256xf32>
    %160 = arith.addf %157, %159 : vector<1x256xf32>
    %161 = arith.mulf %156, %11 : vector<1x256xf32>
    %162 = math.tanh %161 : vector<1x256xf32>
    %163 = arith.mulf %162, %11 : vector<1x256xf32>
    %164 = arith.addf %163, %12 : vector<1x256xf32>
    %165 = vector.extract_strided_slice %164 {offsets = [0, 0], sizes = [1, 64], strides = [1, 1]} : vector<1x256xf32> to vector<1x64xf32>
    %166 = vector.extract_strided_slice %164 {offsets = [0, 64], sizes = [1, 64], strides = [1, 1]} : vector<1x256xf32> to vector<1x64xf32>
    %167 = vector.extract_strided_slice %164 {offsets = [0, 128], sizes = [1, 64], strides = [1, 1]} : vector<1x256xf32> to vector<1x64xf32>
    %168 = vector.extract_strided_slice %164 {offsets = [0, 192], sizes = [1, 64], strides = [1, 1]} : vector<1x256xf32> to vector<1x64xf32>
    %169 = arith.mulf %166, %137 : vector<1x64xf32>
    %170 = arith.mulf %165, %167 : vector<1x64xf32>
    %171 = arith.addf %169, %170 : vector<1x64xf32>
    %172 = math.tanh %171 : vector<1x64xf32>
    %173 = arith.mulf %168, %172 : vector<1x64xf32>
    %174 = arith.mulf %160, %11 : vector<1x256xf32>
    %175 = math.tanh %174 : vector<1x256xf32>
    %176 = arith.mulf %175, %11 : vector<1x256xf32>
    %177 = arith.addf %176, %12 : vector<1x256xf32>
    %178 = vector.extract_strided_slice %177 {offsets = [0, 0], sizes = [1, 64], strides = [1, 1]} : vector<1x256xf32> to vector<1x64xf32>
    %179 = vector.extract_strided_slice %177 {offsets = [0, 64], sizes = [1, 64], strides = [1, 1]} : vector<1x256xf32> to vector<1x64xf32>
    %180 = vector.extract_strided_slice %177 {offsets = [0, 128], sizes = [1, 64], strides = [1, 1]} : vector<1x256xf32> to vector<1x64xf32>
    %181 = vector.extract_strided_slice %177 {offsets = [0, 192], sizes = [1, 64], strides = [1, 1]} : vector<1x256xf32> to vector<1x64xf32>
    %182 = arith.mulf %179, %150 : vector<1x64xf32>
    %183 = arith.mulf %178, %180 : vector<1x64xf32>
    %184 = arith.addf %182, %183 : vector<1x64xf32>
    %185 = math.tanh %184 : vector<1x64xf32>
    %186 = arith.mulf %181, %185 : vector<1x64xf32>
    %187 = vector.extract_strided_slice %5 {offsets = [5, 0], sizes = [1, 256], strides = [1, 1]} : vector<12x512xf32> to vector<1x256xf32>
    %188 = arith.truncf %173 : vector<1x64xf32> to vector<1x64xbf16>
    %cst_26 = arith.constant dense<0.000000e+00> : vector<1x256xf32>
    %189 = tpu.matmul %188, %6, %cst_26 {dimension_numbers = #tpu.dot_dimension_numbers<[1], [0], [0], [1], [0, 0, 1, 1], [], []>} : vector<1x64xbf16>, vector<64x256xbf16>, vector<1x256xf32> -> vector<1x256xf32>
    %190 = arith.addf %187, %189 : vector<1x256xf32>
    %191 = vector.extract_strided_slice %5 {offsets = [6, 256], sizes = [1, 256], strides = [1, 1]} : vector<12x512xf32> to vector<1x256xf32>
    %192 = arith.truncf %186 : vector<1x64xf32> to vector<1x64xbf16>
    %cst_27 = arith.constant dense<0.000000e+00> : vector<1x256xf32>
    %193 = tpu.matmul %192, %7, %cst_27 {dimension_numbers = #tpu.dot_dimension_numbers<[1], [0], [0], [1], [0, 0, 1, 1], [], []>} : vector<1x64xbf16>, vector<64x256xbf16>, vector<1x256xf32> -> vector<1x256xf32>
    %194 = arith.addf %191, %193 : vector<1x256xf32>
    %195 = arith.mulf %190, %11 : vector<1x256xf32>
    %196 = math.tanh %195 : vector<1x256xf32>
    %197 = arith.mulf %196, %11 : vector<1x256xf32>
    %198 = arith.addf %197, %12 : vector<1x256xf32>
    %199 = vector.extract_strided_slice %198 {offsets = [0, 0], sizes = [1, 64], strides = [1, 1]} : vector<1x256xf32> to vector<1x64xf32>
    %200 = vector.extract_strided_slice %198 {offsets = [0, 64], sizes = [1, 64], strides = [1, 1]} : vector<1x256xf32> to vector<1x64xf32>
    %201 = vector.extract_strided_slice %198 {offsets = [0, 128], sizes = [1, 64], strides = [1, 1]} : vector<1x256xf32> to vector<1x64xf32>
    %202 = vector.extract_strided_slice %198 {offsets = [0, 192], sizes = [1, 64], strides = [1, 1]} : vector<1x256xf32> to vector<1x64xf32>
    %203 = arith.mulf %200, %171 : vector<1x64xf32>
    %204 = arith.mulf %199, %201 : vector<1x64xf32>
    %205 = arith.addf %203, %204 : vector<1x64xf32>
    %206 = math.tanh %205 : vector<1x64xf32>
    %207 = arith.mulf %202, %206 : vector<1x64xf32>
    %208 = arith.mulf %194, %11 : vector<1x256xf32>
    %209 = math.tanh %208 : vector<1x256xf32>
    %210 = arith.mulf %209, %11 : vector<1x256xf32>
    %211 = arith.addf %210, %12 : vector<1x256xf32>
    %212 = vector.extract_strided_slice %211 {offsets = [0, 0], sizes = [1, 64], strides = [1, 1]} : vector<1x256xf32> to vector<1x64xf32>
    %213 = vector.extract_strided_slice %211 {offsets = [0, 64], sizes = [1, 64], strides = [1, 1]} : vector<1x256xf32> to vector<1x64xf32>
    %214 = vector.extract_strided_slice %211 {offsets = [0, 128], sizes = [1, 64], strides = [1, 1]} : vector<1x256xf32> to vector<1x64xf32>
    %215 = vector.extract_strided_slice %211 {offsets = [0, 192], sizes = [1, 64], strides = [1, 1]} : vector<1x256xf32> to vector<1x64xf32>
    %216 = arith.mulf %213, %184 : vector<1x64xf32>
    %217 = arith.mulf %212, %214 : vector<1x64xf32>
    %218 = arith.addf %216, %217 : vector<1x64xf32>
    %219 = math.tanh %218 : vector<1x64xf32>
    %220 = arith.mulf %215, %219 : vector<1x64xf32>
    %221 = vector.extract_strided_slice %5 {offsets = [6, 0], sizes = [1, 256], strides = [1, 1]} : vector<12x512xf32> to vector<1x256xf32>
    %222 = arith.truncf %207 : vector<1x64xf32> to vector<1x64xbf16>
    %cst_28 = arith.constant dense<0.000000e+00> : vector<1x256xf32>
    %223 = tpu.matmul %222, %6, %cst_28 {dimension_numbers = #tpu.dot_dimension_numbers<[1], [0], [0], [1], [0, 0, 1, 1], [], []>} : vector<1x64xbf16>, vector<64x256xbf16>, vector<1x256xf32> -> vector<1x256xf32>
    %224 = arith.addf %221, %223 : vector<1x256xf32>
    %225 = vector.extract_strided_slice %5 {offsets = [5, 256], sizes = [1, 256], strides = [1, 1]} : vector<12x512xf32> to vector<1x256xf32>
    %226 = arith.truncf %220 : vector<1x64xf32> to vector<1x64xbf16>
    %cst_29 = arith.constant dense<0.000000e+00> : vector<1x256xf32>
    %227 = tpu.matmul %226, %7, %cst_29 {dimension_numbers = #tpu.dot_dimension_numbers<[1], [0], [0], [1], [0, 0, 1, 1], [], []>} : vector<1x64xbf16>, vector<64x256xbf16>, vector<1x256xf32> -> vector<1x256xf32>
    %228 = arith.addf %225, %227 : vector<1x256xf32>
    %229 = arith.mulf %224, %11 : vector<1x256xf32>
    %230 = math.tanh %229 : vector<1x256xf32>
    %231 = arith.mulf %230, %11 : vector<1x256xf32>
    %232 = arith.addf %231, %12 : vector<1x256xf32>
    %233 = vector.extract_strided_slice %232 {offsets = [0, 0], sizes = [1, 64], strides = [1, 1]} : vector<1x256xf32> to vector<1x64xf32>
    %234 = vector.extract_strided_slice %232 {offsets = [0, 64], sizes = [1, 64], strides = [1, 1]} : vector<1x256xf32> to vector<1x64xf32>
    %235 = vector.extract_strided_slice %232 {offsets = [0, 128], sizes = [1, 64], strides = [1, 1]} : vector<1x256xf32> to vector<1x64xf32>
    %236 = vector.extract_strided_slice %232 {offsets = [0, 192], sizes = [1, 64], strides = [1, 1]} : vector<1x256xf32> to vector<1x64xf32>
    %237 = arith.mulf %234, %205 : vector<1x64xf32>
    %238 = arith.mulf %233, %235 : vector<1x64xf32>
    %239 = arith.addf %237, %238 : vector<1x64xf32>
    %240 = math.tanh %239 : vector<1x64xf32>
    %241 = arith.mulf %236, %240 : vector<1x64xf32>
    %242 = arith.mulf %228, %11 : vector<1x256xf32>
    %243 = math.tanh %242 : vector<1x256xf32>
    %244 = arith.mulf %243, %11 : vector<1x256xf32>
    %245 = arith.addf %244, %12 : vector<1x256xf32>
    %246 = vector.extract_strided_slice %245 {offsets = [0, 0], sizes = [1, 64], strides = [1, 1]} : vector<1x256xf32> to vector<1x64xf32>
    %247 = vector.extract_strided_slice %245 {offsets = [0, 64], sizes = [1, 64], strides = [1, 1]} : vector<1x256xf32> to vector<1x64xf32>
    %248 = vector.extract_strided_slice %245 {offsets = [0, 128], sizes = [1, 64], strides = [1, 1]} : vector<1x256xf32> to vector<1x64xf32>
    %249 = vector.extract_strided_slice %245 {offsets = [0, 192], sizes = [1, 64], strides = [1, 1]} : vector<1x256xf32> to vector<1x64xf32>
    %250 = arith.mulf %247, %218 : vector<1x64xf32>
    %251 = arith.mulf %246, %248 : vector<1x64xf32>
    %252 = arith.addf %250, %251 : vector<1x64xf32>
    %253 = math.tanh %252 : vector<1x64xf32>
    %254 = arith.mulf %249, %253 : vector<1x64xf32>
    %255 = vector.extract_strided_slice %5 {offsets = [7, 0], sizes = [1, 256], strides = [1, 1]} : vector<12x512xf32> to vector<1x256xf32>
    %256 = arith.truncf %241 : vector<1x64xf32> to vector<1x64xbf16>
    %cst_30 = arith.constant dense<0.000000e+00> : vector<1x256xf32>
    %257 = tpu.matmul %256, %6, %cst_30 {dimension_numbers = #tpu.dot_dimension_numbers<[1], [0], [0], [1], [0, 0, 1, 1], [], []>} : vector<1x64xbf16>, vector<64x256xbf16>, vector<1x256xf32> -> vector<1x256xf32>
    %258 = arith.addf %255, %257 : vector<1x256xf32>
    %259 = vector.extract_strided_slice %5 {offsets = [4, 256], sizes = [1, 256], strides = [1, 1]} : vector<12x512xf32> to vector<1x256xf32>
    %260 = arith.truncf %254 : vector<1x64xf32> to vector<1x64xbf16>
    %cst_31 = arith.constant dense<0.000000e+00> : vector<1x256xf32>
    %261 = tpu.matmul %260, %7, %cst_31 {dimension_numbers = #tpu.dot_dimension_numbers<[1], [0], [0], [1], [0, 0, 1, 1], [], []>} : vector<1x64xbf16>, vector<64x256xbf16>, vector<1x256xf32> -> vector<1x256xf32>
    %262 = arith.addf %259, %261 : vector<1x256xf32>
    %263 = arith.mulf %258, %11 : vector<1x256xf32>
    %264 = math.tanh %263 : vector<1x256xf32>
    %265 = arith.mulf %264, %11 : vector<1x256xf32>
    %266 = arith.addf %265, %12 : vector<1x256xf32>
    %267 = vector.extract_strided_slice %266 {offsets = [0, 0], sizes = [1, 64], strides = [1, 1]} : vector<1x256xf32> to vector<1x64xf32>
    %268 = vector.extract_strided_slice %266 {offsets = [0, 64], sizes = [1, 64], strides = [1, 1]} : vector<1x256xf32> to vector<1x64xf32>
    %269 = vector.extract_strided_slice %266 {offsets = [0, 128], sizes = [1, 64], strides = [1, 1]} : vector<1x256xf32> to vector<1x64xf32>
    %270 = vector.extract_strided_slice %266 {offsets = [0, 192], sizes = [1, 64], strides = [1, 1]} : vector<1x256xf32> to vector<1x64xf32>
    %271 = arith.mulf %268, %239 : vector<1x64xf32>
    %272 = arith.mulf %267, %269 : vector<1x64xf32>
    %273 = arith.addf %271, %272 : vector<1x64xf32>
    %274 = math.tanh %273 : vector<1x64xf32>
    %275 = arith.mulf %270, %274 : vector<1x64xf32>
    %276 = arith.mulf %262, %11 : vector<1x256xf32>
    %277 = math.tanh %276 : vector<1x256xf32>
    %278 = arith.mulf %277, %11 : vector<1x256xf32>
    %279 = arith.addf %278, %12 : vector<1x256xf32>
    %280 = vector.extract_strided_slice %279 {offsets = [0, 0], sizes = [1, 64], strides = [1, 1]} : vector<1x256xf32> to vector<1x64xf32>
    %281 = vector.extract_strided_slice %279 {offsets = [0, 64], sizes = [1, 64], strides = [1, 1]} : vector<1x256xf32> to vector<1x64xf32>
    %282 = vector.extract_strided_slice %279 {offsets = [0, 128], sizes = [1, 64], strides = [1, 1]} : vector<1x256xf32> to vector<1x64xf32>
    %283 = vector.extract_strided_slice %279 {offsets = [0, 192], sizes = [1, 64], strides = [1, 1]} : vector<1x256xf32> to vector<1x64xf32>
    %284 = arith.mulf %281, %252 : vector<1x64xf32>
    %285 = arith.mulf %280, %282 : vector<1x64xf32>
    %286 = arith.addf %284, %285 : vector<1x64xf32>
    %287 = math.tanh %286 : vector<1x64xf32>
    %288 = arith.mulf %283, %287 : vector<1x64xf32>
    %289 = vector.extract_strided_slice %5 {offsets = [8, 0], sizes = [1, 256], strides = [1, 1]} : vector<12x512xf32> to vector<1x256xf32>
    %290 = arith.truncf %275 : vector<1x64xf32> to vector<1x64xbf16>
    %cst_32 = arith.constant dense<0.000000e+00> : vector<1x256xf32>
    %291 = tpu.matmul %290, %6, %cst_32 {dimension_numbers = #tpu.dot_dimension_numbers<[1], [0], [0], [1], [0, 0, 1, 1], [], []>} : vector<1x64xbf16>, vector<64x256xbf16>, vector<1x256xf32> -> vector<1x256xf32>
    %292 = arith.addf %289, %291 : vector<1x256xf32>
    %293 = vector.extract_strided_slice %5 {offsets = [3, 256], sizes = [1, 256], strides = [1, 1]} : vector<12x512xf32> to vector<1x256xf32>
    %294 = arith.truncf %288 : vector<1x64xf32> to vector<1x64xbf16>
    %cst_33 = arith.constant dense<0.000000e+00> : vector<1x256xf32>
    %295 = tpu.matmul %294, %7, %cst_33 {dimension_numbers = #tpu.dot_dimension_numbers<[1], [0], [0], [1], [0, 0, 1, 1], [], []>} : vector<1x64xbf16>, vector<64x256xbf16>, vector<1x256xf32> -> vector<1x256xf32>
    %296 = arith.addf %293, %295 : vector<1x256xf32>
    %297 = arith.mulf %292, %11 : vector<1x256xf32>
    %298 = math.tanh %297 : vector<1x256xf32>
    %299 = arith.mulf %298, %11 : vector<1x256xf32>
    %300 = arith.addf %299, %12 : vector<1x256xf32>
    %301 = vector.extract_strided_slice %300 {offsets = [0, 0], sizes = [1, 64], strides = [1, 1]} : vector<1x256xf32> to vector<1x64xf32>
    %302 = vector.extract_strided_slice %300 {offsets = [0, 64], sizes = [1, 64], strides = [1, 1]} : vector<1x256xf32> to vector<1x64xf32>
    %303 = vector.extract_strided_slice %300 {offsets = [0, 128], sizes = [1, 64], strides = [1, 1]} : vector<1x256xf32> to vector<1x64xf32>
    %304 = vector.extract_strided_slice %300 {offsets = [0, 192], sizes = [1, 64], strides = [1, 1]} : vector<1x256xf32> to vector<1x64xf32>
    %305 = arith.mulf %302, %273 : vector<1x64xf32>
    %306 = arith.mulf %301, %303 : vector<1x64xf32>
    %307 = arith.addf %305, %306 : vector<1x64xf32>
    %308 = math.tanh %307 : vector<1x64xf32>
    %309 = arith.mulf %304, %308 : vector<1x64xf32>
    %310 = arith.mulf %296, %11 : vector<1x256xf32>
    %311 = math.tanh %310 : vector<1x256xf32>
    %312 = arith.mulf %311, %11 : vector<1x256xf32>
    %313 = arith.addf %312, %12 : vector<1x256xf32>
    %314 = vector.extract_strided_slice %313 {offsets = [0, 0], sizes = [1, 64], strides = [1, 1]} : vector<1x256xf32> to vector<1x64xf32>
    %315 = vector.extract_strided_slice %313 {offsets = [0, 64], sizes = [1, 64], strides = [1, 1]} : vector<1x256xf32> to vector<1x64xf32>
    %316 = vector.extract_strided_slice %313 {offsets = [0, 128], sizes = [1, 64], strides = [1, 1]} : vector<1x256xf32> to vector<1x64xf32>
    %317 = vector.extract_strided_slice %313 {offsets = [0, 192], sizes = [1, 64], strides = [1, 1]} : vector<1x256xf32> to vector<1x64xf32>
    %318 = arith.mulf %315, %286 : vector<1x64xf32>
    %319 = arith.mulf %314, %316 : vector<1x64xf32>
    %320 = arith.addf %318, %319 : vector<1x64xf32>
    %321 = math.tanh %320 : vector<1x64xf32>
    %322 = arith.mulf %317, %321 : vector<1x64xf32>
    %323 = vector.extract_strided_slice %5 {offsets = [9, 0], sizes = [1, 256], strides = [1, 1]} : vector<12x512xf32> to vector<1x256xf32>
    %324 = arith.truncf %309 : vector<1x64xf32> to vector<1x64xbf16>
    %cst_34 = arith.constant dense<0.000000e+00> : vector<1x256xf32>
    %325 = tpu.matmul %324, %6, %cst_34 {dimension_numbers = #tpu.dot_dimension_numbers<[1], [0], [0], [1], [0, 0, 1, 1], [], []>} : vector<1x64xbf16>, vector<64x256xbf16>, vector<1x256xf32> -> vector<1x256xf32>
    %326 = arith.addf %323, %325 : vector<1x256xf32>
    %327 = vector.extract_strided_slice %5 {offsets = [2, 256], sizes = [1, 256], strides = [1, 1]} : vector<12x512xf32> to vector<1x256xf32>
    %328 = arith.truncf %322 : vector<1x64xf32> to vector<1x64xbf16>
    %cst_35 = arith.constant dense<0.000000e+00> : vector<1x256xf32>
    %329 = tpu.matmul %328, %7, %cst_35 {dimension_numbers = #tpu.dot_dimension_numbers<[1], [0], [0], [1], [0, 0, 1, 1], [], []>} : vector<1x64xbf16>, vector<64x256xbf16>, vector<1x256xf32> -> vector<1x256xf32>
    %330 = arith.addf %327, %329 : vector<1x256xf32>
    %331 = arith.mulf %326, %11 : vector<1x256xf32>
    %332 = math.tanh %331 : vector<1x256xf32>
    %333 = arith.mulf %332, %11 : vector<1x256xf32>
    %334 = arith.addf %333, %12 : vector<1x256xf32>
    %335 = vector.extract_strided_slice %334 {offsets = [0, 0], sizes = [1, 64], strides = [1, 1]} : vector<1x256xf32> to vector<1x64xf32>
    %336 = vector.extract_strided_slice %334 {offsets = [0, 64], sizes = [1, 64], strides = [1, 1]} : vector<1x256xf32> to vector<1x64xf32>
    %337 = vector.extract_strided_slice %334 {offsets = [0, 128], sizes = [1, 64], strides = [1, 1]} : vector<1x256xf32> to vector<1x64xf32>
    %338 = vector.extract_strided_slice %334 {offsets = [0, 192], sizes = [1, 64], strides = [1, 1]} : vector<1x256xf32> to vector<1x64xf32>
    %339 = arith.mulf %336, %307 : vector<1x64xf32>
    %340 = arith.mulf %335, %337 : vector<1x64xf32>
    %341 = arith.addf %339, %340 : vector<1x64xf32>
    %342 = math.tanh %341 : vector<1x64xf32>
    %343 = arith.mulf %338, %342 : vector<1x64xf32>
    %344 = arith.mulf %330, %11 : vector<1x256xf32>
    %345 = math.tanh %344 : vector<1x256xf32>
    %346 = arith.mulf %345, %11 : vector<1x256xf32>
    %347 = arith.addf %346, %12 : vector<1x256xf32>
    %348 = vector.extract_strided_slice %347 {offsets = [0, 0], sizes = [1, 64], strides = [1, 1]} : vector<1x256xf32> to vector<1x64xf32>
    %349 = vector.extract_strided_slice %347 {offsets = [0, 64], sizes = [1, 64], strides = [1, 1]} : vector<1x256xf32> to vector<1x64xf32>
    %350 = vector.extract_strided_slice %347 {offsets = [0, 128], sizes = [1, 64], strides = [1, 1]} : vector<1x256xf32> to vector<1x64xf32>
    %351 = vector.extract_strided_slice %347 {offsets = [0, 192], sizes = [1, 64], strides = [1, 1]} : vector<1x256xf32> to vector<1x64xf32>
    %352 = arith.mulf %349, %320 : vector<1x64xf32>
    %353 = arith.mulf %348, %350 : vector<1x64xf32>
    %354 = arith.addf %352, %353 : vector<1x64xf32>
    %355 = math.tanh %354 : vector<1x64xf32>
    %356 = arith.mulf %351, %355 : vector<1x64xf32>
    %357 = vector.extract_strided_slice %5 {offsets = [10, 0], sizes = [1, 256], strides = [1, 1]} : vector<12x512xf32> to vector<1x256xf32>
    %358 = arith.truncf %343 : vector<1x64xf32> to vector<1x64xbf16>
    %cst_36 = arith.constant dense<0.000000e+00> : vector<1x256xf32>
    %359 = tpu.matmul %358, %6, %cst_36 {dimension_numbers = #tpu.dot_dimension_numbers<[1], [0], [0], [1], [0, 0, 1, 1], [], []>} : vector<1x64xbf16>, vector<64x256xbf16>, vector<1x256xf32> -> vector<1x256xf32>
    %360 = arith.addf %357, %359 : vector<1x256xf32>
    %361 = vector.extract_strided_slice %5 {offsets = [1, 256], sizes = [1, 256], strides = [1, 1]} : vector<12x512xf32> to vector<1x256xf32>
    %362 = arith.truncf %356 : vector<1x64xf32> to vector<1x64xbf16>
    %cst_37 = arith.constant dense<0.000000e+00> : vector<1x256xf32>
    %363 = tpu.matmul %362, %7, %cst_37 {dimension_numbers = #tpu.dot_dimension_numbers<[1], [0], [0], [1], [0, 0, 1, 1], [], []>} : vector<1x64xbf16>, vector<64x256xbf16>, vector<1x256xf32> -> vector<1x256xf32>
    %364 = arith.addf %361, %363 : vector<1x256xf32>
    %365 = arith.mulf %360, %11 : vector<1x256xf32>
    %366 = math.tanh %365 : vector<1x256xf32>
    %367 = arith.mulf %366, %11 : vector<1x256xf32>
    %368 = arith.addf %367, %12 : vector<1x256xf32>
    %369 = vector.extract_strided_slice %368 {offsets = [0, 0], sizes = [1, 64], strides = [1, 1]} : vector<1x256xf32> to vector<1x64xf32>
    %370 = vector.extract_strided_slice %368 {offsets = [0, 64], sizes = [1, 64], strides = [1, 1]} : vector<1x256xf32> to vector<1x64xf32>
    %371 = vector.extract_strided_slice %368 {offsets = [0, 128], sizes = [1, 64], strides = [1, 1]} : vector<1x256xf32> to vector<1x64xf32>
    %372 = vector.extract_strided_slice %368 {offsets = [0, 192], sizes = [1, 64], strides = [1, 1]} : vector<1x256xf32> to vector<1x64xf32>
    %373 = arith.mulf %370, %341 : vector<1x64xf32>
    %374 = arith.mulf %369, %371 : vector<1x64xf32>
    %375 = arith.addf %373, %374 : vector<1x64xf32>
    %376 = math.tanh %375 : vector<1x64xf32>
    %377 = arith.mulf %372, %376 : vector<1x64xf32>
    %378 = arith.mulf %364, %11 : vector<1x256xf32>
    %379 = math.tanh %378 : vector<1x256xf32>
    %380 = arith.mulf %379, %11 : vector<1x256xf32>
    %381 = arith.addf %380, %12 : vector<1x256xf32>
    %382 = vector.extract_strided_slice %381 {offsets = [0, 0], sizes = [1, 64], strides = [1, 1]} : vector<1x256xf32> to vector<1x64xf32>
    %383 = vector.extract_strided_slice %381 {offsets = [0, 64], sizes = [1, 64], strides = [1, 1]} : vector<1x256xf32> to vector<1x64xf32>
    %384 = vector.extract_strided_slice %381 {offsets = [0, 128], sizes = [1, 64], strides = [1, 1]} : vector<1x256xf32> to vector<1x64xf32>
    %385 = vector.extract_strided_slice %381 {offsets = [0, 192], sizes = [1, 64], strides = [1, 1]} : vector<1x256xf32> to vector<1x64xf32>
    %386 = arith.mulf %383, %354 : vector<1x64xf32>
    %387 = arith.mulf %382, %384 : vector<1x64xf32>
    %388 = arith.addf %386, %387 : vector<1x64xf32>
    %389 = math.tanh %388 : vector<1x64xf32>
    %390 = arith.mulf %385, %389 : vector<1x64xf32>
    %391 = vector.extract_strided_slice %5 {offsets = [11, 0], sizes = [1, 256], strides = [1, 1]} : vector<12x512xf32> to vector<1x256xf32>
    %392 = arith.truncf %377 : vector<1x64xf32> to vector<1x64xbf16>
    %cst_38 = arith.constant dense<0.000000e+00> : vector<1x256xf32>
    %393 = tpu.matmul %392, %6, %cst_38 {dimension_numbers = #tpu.dot_dimension_numbers<[1], [0], [0], [1], [0, 0, 1, 1], [], []>} : vector<1x64xbf16>, vector<64x256xbf16>, vector<1x256xf32> -> vector<1x256xf32>
    %394 = arith.addf %391, %393 : vector<1x256xf32>
    %395 = vector.extract_strided_slice %5 {offsets = [0, 256], sizes = [1, 256], strides = [1, 1]} : vector<12x512xf32> to vector<1x256xf32>
    %396 = arith.truncf %390 : vector<1x64xf32> to vector<1x64xbf16>
    %cst_39 = arith.constant dense<0.000000e+00> : vector<1x256xf32>
    %397 = tpu.matmul %396, %7, %cst_39 {dimension_numbers = #tpu.dot_dimension_numbers<[1], [0], [0], [1], [0, 0, 1, 1], [], []>} : vector<1x64xbf16>, vector<64x256xbf16>, vector<1x256xf32> -> vector<1x256xf32>
    %398 = arith.addf %395, %397 : vector<1x256xf32>
    %399 = arith.mulf %394, %11 : vector<1x256xf32>
    %400 = math.tanh %399 : vector<1x256xf32>
    %401 = arith.mulf %400, %11 : vector<1x256xf32>
    %402 = arith.addf %401, %12 : vector<1x256xf32>
    %403 = vector.extract_strided_slice %402 {offsets = [0, 0], sizes = [1, 64], strides = [1, 1]} : vector<1x256xf32> to vector<1x64xf32>
    %404 = vector.extract_strided_slice %402 {offsets = [0, 64], sizes = [1, 64], strides = [1, 1]} : vector<1x256xf32> to vector<1x64xf32>
    %405 = vector.extract_strided_slice %402 {offsets = [0, 128], sizes = [1, 64], strides = [1, 1]} : vector<1x256xf32> to vector<1x64xf32>
    %406 = vector.extract_strided_slice %402 {offsets = [0, 192], sizes = [1, 64], strides = [1, 1]} : vector<1x256xf32> to vector<1x64xf32>
    %407 = arith.mulf %404, %375 : vector<1x64xf32>
    %408 = arith.mulf %403, %405 : vector<1x64xf32>
    %409 = arith.addf %407, %408 : vector<1x64xf32>
    %410 = math.tanh %409 : vector<1x64xf32>
    %411 = arith.mulf %406, %410 : vector<1x64xf32>
    %412 = arith.mulf %398, %11 : vector<1x256xf32>
    %413 = math.tanh %412 : vector<1x256xf32>
    %414 = arith.mulf %413, %11 : vector<1x256xf32>
    %415 = arith.addf %414, %12 : vector<1x256xf32>
    %416 = vector.extract_strided_slice %415 {offsets = [0, 0], sizes = [1, 64], strides = [1, 1]} : vector<1x256xf32> to vector<1x64xf32>
    %417 = vector.extract_strided_slice %415 {offsets = [0, 64], sizes = [1, 64], strides = [1, 1]} : vector<1x256xf32> to vector<1x64xf32>
    %418 = vector.extract_strided_slice %415 {offsets = [0, 128], sizes = [1, 64], strides = [1, 1]} : vector<1x256xf32> to vector<1x64xf32>
    %419 = vector.extract_strided_slice %415 {offsets = [0, 192], sizes = [1, 64], strides = [1, 1]} : vector<1x256xf32> to vector<1x64xf32>
    %420 = arith.mulf %417, %388 : vector<1x64xf32>
    %421 = arith.mulf %416, %418 : vector<1x64xf32>
    %422 = arith.addf %420, %421 : vector<1x64xf32>
    %423 = math.tanh %422 : vector<1x64xf32>
    %424 = arith.mulf %419, %423 : vector<1x64xf32>
    %425 = tpu.concatenate %37, %71, %105, %139, %173, %207, %241, %275, %309, %343, %377, %411 in 0 : vector<1x64xf32>, vector<1x64xf32>, vector<1x64xf32>, vector<1x64xf32>, vector<1x64xf32>, vector<1x64xf32>, vector<1x64xf32>, vector<1x64xf32>, vector<1x64xf32>, vector<1x64xf32>, vector<1x64xf32>, vector<1x64xf32> -> vector<12x64xf32>
    %426 = tpu.concatenate %424, %390, %356, %322, %288, %254, %220, %186, %152, %118, %84, %50 in 0 : vector<1x64xf32>, vector<1x64xf32>, vector<1x64xf32>, vector<1x64xf32>, vector<1x64xf32>, vector<1x64xf32>, vector<1x64xf32>, vector<1x64xf32>, vector<1x64xf32>, vector<1x64xf32>, vector<1x64xf32>, vector<1x64xf32> -> vector<12x64xf32>
    %427 = tpu.concatenate %425, %426 in 1 : vector<12x64xf32>, vector<12x64xf32> -> vector<12x128xf32>
    %c0_40 = arith.constant 0 : index
    %c0_41 = arith.constant 0 : index
    %428 = vector.load %arg5[%c0_40, %c0_41] : memref<12x128xf32, #tpu.memory_space<vmem>>, vector<12x128xf32>
    tpu.vector_store %arg5[%c0_40, %c0_41], %427 {strides = array<i32>} : memref<12x128xf32, #tpu.memory_space<vmem>>, vector<12x128xf32>,
    return
  }
}

</mosaic_0001>

<bundles_post_ra>
// kernel: tpu_custom_call.1
= control target key start
LH: loop header
LB: loop body
LE: loop exit
PB: predicated region body
PF: predicated region fallthrough
CT: control target
= control target key end

     0   :  { %10 = vsyncpa [#allocation3], 0  ;;  %s3579_s0 = inlined_call_operand.hbm [shape: bf16[12,32], index: 0, kind: input, shape index: {}]   ;;  %s3580_s1 = inlined_call_operand.hbm [shape: bf16[32,512], index: 1, kind: input, shape index: {}]   ;;  %s3581_s2 = inlined_call_operand.hbm [shape: bf16[64,256], index: 2, kind: input, shape index: {}]   ;;  %s3582_s3 = inlined_call_operand.hbm [shape: bf16[64,256], index: 3, kind: input, shape index: {}]   ;;  %s3583_s4 = inlined_call_operand.vmem [shape: f32[1,512], index: 4, kind: input, shape index: {}]   ;;  %s3584_s5 = inlined_call_operand.hbm [shape: f32[12,128], index: 5, kind: output, shape index: {}]  }
   0x1   :  { %11 = vsyncpa [#allocation6], 0 }
   0x2   :  { %12 = vsyncpa [#allocation9], 0 }
   0x3   :  { %13 = vsyncpa [#allocation4], 0  ;;  %s2643_s18 = smov [#allocation5]   ;;  %s2525_s22 = scalar_lea.hbm %s3580_s1, 1024 }
   0x4   :  { %s31_s19 = sshll.u32 %s2643_s18, 4  ;;  %p2526_p0 = scmp.ne.s32.totalorder %s3580_s1, %s2525_s22  ;;  %s32_s19 = int_to_ptr.vmem [resolvable:$true] %s31_s19 }
   0x5   :  { %p2529_p1 = scmp.lt.u32.totalorder %s2525_s22, %s3580_s1 }
   0x7   :  { %p2531_p2 = pnand %p2529_p1, %p2526_p0 }
   0x9   :  { %2534 = shalt.err (!%p2531_p2)
}
   0xa   :  { %s2535_s27 = scalar_lea.vmem %s32_s19, 1024  ;;  %p2540_p4 = scmp.lt.s32.totalorder %s32_s19, %s32_s19 }
   0xb   :  { %p2536_p3 = scmp.ne.s32.totalorder %s32_s19, %s2535_s27  ;;  %p2541_p5 = scmp.lt.s32.totalorder %s2535_s27, %s2535_s27 }
   0xd   :  { %p2542_p6 = por %p2541_p5, %p2540_p4 }
   0xf   :  { %p2543_p7 = pnand %p2542_p6, %p2536_p3 }
  0x11   :  { %2546 = shalt.err (!%p2543_p7)
}
  0x12   :  { %s2644_s28 = smov 256   ;;  %s2645_s29 = smov 16  }
  0x13   :  { %37 = dma.hbm_to_vmem [thread:$0]  %s3580_s1, 1024, %s32_s19, [#allocation6], %s2644_s28, %s2644_s28, %s2645_s29  }
  0x14   :  { %s2646_s7 = smov [#allocation2]   ;;  %s2547_s11 = scalar_lea.hbm %s3579_s0, 128 }
  0x15   :  { %s19_s8 = sshll.u32 %s2646_s7, 4  ;;  %p2548_p8 = scmp.ne.s32.totalorder %s3579_s0, %s2547_s11  ;;  %s20_s8 = int_to_ptr.vmem [resolvable:$true] %s19_s8 }
  0x16   :  { %p2551_p9 = scmp.lt.u32.totalorder %s2547_s11, %s3579_s0 }
  0x18   :  { %p2553_p10 = pnand %p2551_p9, %p2548_p8 }
  0x1a   :  { %2556 = shalt.err (!%p2553_p10)
}
  0x1b   :  { %s2557_s16 = scalar_lea.vmem %s20_s8, 128  ;;  %p2562_p12 = scmp.lt.s32.totalorder %s20_s8, %s20_s8 }
  0x1c   :  { %p2558_p11 = scmp.ne.s32.totalorder %s20_s8, %s2557_s16  ;;  %p2563_p13 = scmp.lt.s32.totalorder %s2557_s16, %s2557_s16 }
  0x1e   :  { %p2564_p0 = por %p2563_p13, %p2562_p12 }
  0x20   :  { %p2565_p1 = pnand %p2564_p0, %p2558_p11 }
  0x22   :  { %2568 = shalt.err (!%p2565_p1)
}
  0x23   :  { %s2647_s1 = smov 64   ;;  %s2648_s17 = smov 4  }
  0x24   :  { %25 = dma.hbm_to_vmem [thread:$0]  %s3579_s0, 128, %s20_s8, [#allocation3], %s2647_s1, %s2647_s1, %s2648_s17  }
  0x25   :  { %s2649_s20 = smov [#allocation7]   ;;  %s2569_s24 = scalar_lea.hbm %s3581_s2, 1024 }
  0x26   :  { %s43_s21 = sshll.u32 %s2649_s20, 4  ;;  %p2570_p2 = scmp.ne.s32.totalorder %s3581_s2, %s2569_s24  ;;  %s44_s21 = int_to_ptr.vmem [resolvable:$true] %s43_s21 }
  0x27   :  { %p2573_p3 = scmp.lt.u32.totalorder %s2569_s24, %s3581_s2 }
  0x29   :  { %p2575_p4 = pnand %p2573_p3, %p2570_p2 }
  0x2b   :  { %2578 = shalt.err (!%p2575_p4)
}
  0x2c   :  { %s2579_s29 = scalar_lea.vmem %s44_s21, 1024  ;;  %p2584_p6 = scmp.lt.s32.totalorder %s44_s21, %s44_s21 }
  0x2d   :  { %p2580_p5 = scmp.ne.s32.totalorder %s44_s21, %s2579_s29  ;;  %p2585_p7 = scmp.lt.s32.totalorder %s2579_s29, %s2579_s29 }
  0x2f   :  { %p2586_p8 = por %p2585_p7, %p2584_p6 }
  0x31   :  { %p2587_p9 = pnand %p2586_p8, %p2580_p5 }
  0x33   :  { %2590 = shalt.err (!%p2587_p9)
}
  0x34   :  { %s2650_s0 = smov 128   ;;  %s2651_s30 = smov 8  }
  0x35   :  { %49 = dma.hbm_to_vmem [thread:$0]  %s3581_s2, 1024, %s44_s21, [#allocation6], %s2650_s0, %s2650_s0, %s2651_s30  }
  0x36   :  { %s2652_s8 = smov [#allocation8]   ;;  %s2591_s12 = scalar_lea.hbm %s3582_s3, 1024 }
  0x37   :  { %s55_s9 = sshll.u32 %s2652_s8, 4  ;;  %p2592_p10 = scmp.ne.s32.totalorder %s3582_s3, %s2591_s12  ;;  %s56_s9 = int_to_ptr.vmem [resolvable:$true] %s55_s9 }
  0x38   :  { %p2595_p11 = scmp.lt.u32.totalorder %s2591_s12, %s3582_s3 }
  0x3a   :  { %p2597_p12 = pnand %p2595_p11, %p2592_p10 }
  0x3c   :  { %2600 = shalt.err (!%p2597_p12)
}
  0x3d   :  { %s2601_s17 = scalar_lea.vmem %s56_s9, 1024  ;;  %p2606_p0 = scmp.lt.s32.totalorder %s56_s9, %s56_s9 }
  0x3e   :  { %p2602_p13 = scmp.ne.s32.totalorder %s56_s9, %s2601_s17  ;;  %p2607_p1 = scmp.lt.s32.totalorder %s2601_s17, %s2601_s17 }
  0x40   :  { %p2608_p2 = por %p2607_p1, %p2606_p0 }
  0x42   :  { %p2609_p3 = pnand %p2608_p2, %p2602_p13 }
  0x44   :  { %2612 = shalt.err (!%p2609_p3)
}
  0x45   :  { %61 = dma.hbm_to_vmem [thread:$0]  %s3582_s3, 1024, %s56_s9, [#allocation9], %s2650_s0, %s2650_s0, %s2651_s30  }
  0x46   :  { %2635 = dma.done.wait [#allocation3], 128  }
  0x47   :  { %2636 = vsyncadd [#allocation3], 4294967168 }
  0x48   :  { %2637 = dma.done.wait [#allocation6], 2048  }
  0x49   :  { %2638 = vsyncadd [#allocation6], 4294965248 }
  0x4a   :  { %2639 = dma.done.wait [#allocation9], 1024  }
  0x4b   :  { %2640 = vsyncadd [#allocation9], 4294966272  ;;  %v3587_v0 = vmov 0   ;;  %v2328_v1 = vld [vmem:[#allocation5 + $0x4] ss:$16 sps:$4 sm:$0xff]   ;;  %vm154_vm0 = vcmask 261120   ;;  %v89_v26 = vlaneseq }
  0x4c   :  { %190 = vmatprep.mubr.bf16.mxu0 %v3587_v0  ;;  %233 = vmatprep.mubr.bf16.mxu1 %v3587_v0  ;;  %v2330_v2 = vld [vmem:[#allocation5] ss:$16 sps:$4 sm:$0xff]   ;;  %v2331_v3 = vld [vmem:[#allocation5 + $0xc] ss:$16 sps:$4 sm:$0xff]   ;;  %v2333_v4 = vld [vmem:[#allocation5 + $0x8] ss:$16 sps:$4 sm:$0xff]  }
  0x4d   :  { %158 = vmatprep.subr.bf16.mxu0 %v2328_v1  ;;  %v2334_v5 = vld [vmem:[#allocation5 + $0x24] ss:$16 sps:$4 sm:$0xff]   ;;  %v2336_v6 = vld [vmem:[#allocation5 + $0x20] ss:$16 sps:$4 sm:$0xff]   ;;  %201 = vmatprep.subr.bf16.mxu1 %v2331_v3  ;;  %v2337_v7 = vld [vmem:[#allocation5 + $0x2c] ss:$16 sps:$4 sm:$0xff]  }
  0x4e   :  { %159 = vmatpush1.bf16.msra.mxu0 %v2330_v2  ;;  %202 = vmatpush1.bf16.msra.mxu1 %v2333_v4  ;;  %v2339_v8 = vld [vmem:[#allocation5 + $0x28] ss:$16 sps:$4 sm:$0xff]   ;;  %v2744_v10 = vld [vmem:[#allocation7 + $0x4] ss:$8 sps:$4 sm:$0xff]   ;;  %v2753_v14 = vld [vmem:[#allocation7 + $0x14] ss:$8 sps:$4 sm:$0xff]  }
  0x4f   :  { %160 = vmatprep.subr.bf16.mxu0 %v2334_v5  ;;  %203 = vmatprep.subr.bf16.mxu1 %v2337_v7  ;;  %v2340_v9 = vld [vmem:[#allocation2] sm:$0x3f]   ;;  %v2746_v11 = vld [vmem:[#allocation7] ss:$8 sps:$4 sm:$0xff]   ;;  %v2748_v12 = vld [vmem:[#allocation8 + $0x4] ss:$8 sps:$4 sm:$0xff]  }
  0x50   :  { %v2750_v13 = vld [vmem:[#allocation8] ss:$8 sps:$4 sm:$0xff]   ;;  %v2757_v15 = vld [vmem:[#allocation7 + $0x10] ss:$8 sps:$4 sm:$0xff]   ;;  %v2759_v16 = vld [vmem:[#allocation8 + $0x14] ss:$8 sps:$4 sm:$0xff]  }
  0x51   :  { %v2763_v17 = vld [vmem:[#allocation7 + $0x24] ss:$8 sps:$4 sm:$0xff]   ;;  %v2766_v18 = vld [vmem:[#allocation8 + $0x10] ss:$8 sps:$4 sm:$0xff]   ;;  %v2773_v20 = vld [vmem:[#allocation7 + $0x20] ss:$8 sps:$4 sm:$0xff]  }
  0x52   :  { %161 = vmatpush1.bf16.msra.mxu0 %v2336_v6  ;;  %204 = vmatpush1.bf16.msra.mxu1 %v2339_v8  ;;  %v2770_v19 = vld [vmem:[#allocation8 + $0x24] ss:$8 sps:$4 sm:$0xff]   ;;  %v2776_v21 = vld [vmem:[#allocation7 + $0x34] ss:$8 sps:$4 sm:$0xff]   ;;  %v2779_v22 = vld [vmem:[#allocation8 + $0x20] ss:$8 sps:$4 sm:$0xff]  }
  0x53   :  { %306 = vmatprep.subr.bf16.mxu0 %v2744_v10  ;;  %389 = vmatprep.subr.bf16.mxu1 %v2748_v12  ;;  %v2782_v23 = vld [vmem:[#allocation8 + $0x34] ss:$8 sps:$4 sm:$0xff]   ;;  %v2785_v24 = vld [vmem:[#allocation7 + $0x30] ss:$8 sps:$4 sm:$0xff]   ;;  %v90_v27 = vshrl.u32 %v89_v26, 7  ;;  %vm260_vm1 = vcmask 523264  }
  0x54   :  { %v2789_v25 = vld [vmem:[#allocation8 + $0x30] ss:$8 sps:$4 sm:$0xff]   ;;  %v2654_v54 = vmov 0.5   ;;  %vm2208_vm2 = vcmask 1040384   ;;  %vm2210_vm3 = vcmask 1041408   ;;  %vm2212_vm4 = vcmask 1042432  }
  0x55   :  { %2275 = vmatmul.mubr.msk.bf16.vlgmr.msra.gmra.mrb[0].mxu0 %vm154_vm0, %v2340_v9  ;;  %2276 = vmatmul.mubr.msk.bf16.vlgmr.msra.gmra.mrb[0].mxu1 %vm154_vm0, %v2340_v9  ;;  %v91_v28 = vsub.s32 0, %v90_v27  ;;  %v87_v29 = vld [vmem:[%s3583_s4] sm:$0xf]  ;;  %v99_v30 = vsub.s32 2, %v90_v27  ;;  %v95_v31 = vsub.s32 1, %v90_v27  ;;  %v103_v32 = vsub.s32 3, %v90_v27 }
  0x56   :  { %307 = vmatpush1.bf16.msra.mxu0 %v2746_v11  ;;  %338 = vmatprep.mubr.bf16.mxu0 %v3587_v0  ;;  %v2836_v55 = vsel %vm260_vm1, 1.0, %v2654_v54  ;;  %v2842_v63 = vrot.slane %v2654_v54, 5  ;;  %vm2214_vm5 = vcmask 1043456   ;;  %vm2216_vm6 = vcmask 1044480   ;;  %s2655_s4 = smov [#allocation10]  }
  0x57   :  { %308 = vmatprep.subr.bf16.mxu0 %v2753_v14  ;;  %390 = vmatpush1.bf16.msra.mxu1 %v2750_v13  ;;  %v92_v33 = vrot.slane %v87_v29, %v91_v28  ;;  %v100_v36 = vrot.slane %v87_v29, %v99_v30  ;;  %v96_v37 = vrot.slane %v87_v29, %v95_v31  ;;  %v2846_v5 = vrot.slane %v2836_v55, 5 }
  0x58   :  { %421 = vmatprep.mubr.bf16.mxu1 %v3587_v0  ;;  %391 = vmatprep.subr.bf16.mxu1 %v2759_v16  ;;  %v104_v40 = vrot.slane %v87_v29, %v103_v32  ;;  %v2854_v30 = vsel %vm260_vm1, 0.0, %v2654_v54  ;;  %vm2218_vm7 = vcmask 1045504   ;;  %vm2220_vm8 = vcmask 1046528  }
  0x5a   :  { %309 = vmatpush1.bf16.msra.mxu0 %v2757_v15 }
  0x5b   :  { %310 = vmatprep.subr.bf16.mxu0 %v2763_v17  ;;  %392 = vmatpush1.bf16.msra.mxu1 %v2766_v18 }
  0x5c   :  { %393 = vmatprep.subr.bf16.mxu1 %v2770_v19 }
  0x5e   :  { %311 = vmatpush1.bf16.msra.mxu0 %v2773_v20 }
  0x5f   :  { %312 = vmatprep.subr.bf16.mxu0 %v2776_v21  ;;  %394 = vmatpush1.bf16.msra.mxu1 %v2779_v22 }
  0x60   :  { %395 = vmatprep.subr.bf16.mxu1 %v2782_v23 }
  0x62   :  { %313 = vmatpush1.bf16.msra.mxu0 %v2785_v24 }
  0x63   :  { %488 = vmatprep.subr.bf16.mxu0 %v2744_v10  ;;  %396 = vmatpush1.bf16.msra.mxu1 %v2789_v25 }
  0x64   :  { %547 = vmatprep.subr.bf16.mxu1 %v2748_v12 }
  0x65   :  { %339 = vmatmul.mubr.bf16.vlgmr.msra.gmra.mrb[4].mxu0 %v3587_v0 }
  0x66   :  { %489 = vmatpush1.bf16.msra.mxu0 %v2746_v11  ;;  %520 = vmatprep.mubr.bf16.mxu0 %v3587_v0 }
  0x67   :  { %422 = vmatmul.mubr.bf16.vlgmr.msra.gmra.mrb[4].mxu1 %v3587_v0  ;;  %490 = vmatprep.subr.bf16.mxu0 %v2753_v14 }
  0x68   :  { %548 = vmatpush1.bf16.msra.mxu1 %v2750_v13  ;;  %579 = vmatprep.mubr.bf16.mxu1 %v3587_v0 }
  0x69   :  { %549 = vmatprep.subr.bf16.mxu1 %v2759_v16 }
  0x6a   :  { %491 = vmatpush1.bf16.msra.mxu0 %v2757_v15 }
  0x6b   :  { %492 = vmatprep.subr.bf16.mxu0 %v2763_v17 }
  0x6c   :  { %550 = vmatpush1.bf16.msra.mxu1 %v2766_v18 }
  0x6d   :  { %551 = vmatprep.subr.bf16.mxu1 %v2770_v19 }
  0x6e   :  { %493 = vmatpush1.bf16.msra.mxu0 %v2773_v20 }
  0x6f   :  { %494 = vmatprep.subr.bf16.mxu0 %v2776_v21 }
  0x70   :  { %552 = vmatpush1.bf16.msra.mxu1 %v2779_v22 }
  0x71   :  { %553 = vmatprep.subr.bf16.mxu1 %v2782_v23 }
  0x72   :  { %495 = vmatpush1.bf16.msra.mxu0 %v2785_v24 }
  0x73   :  { %657 = vmatprep.subr.bf16.mxu0 %v2744_v10 }
  0x74   :  { %554 = vmatpush1.bf16.msra.mxu1 %v2789_v25 }
  0x75   :  { %714 = vmatprep.subr.bf16.mxu1 %v2748_v12 }
 0x128   :  { %v192_v34 = vpop.f32.mrb[0].mxu0  ;;  %v235_v39 = vpop.f32.mrb[0].mxu1 }
 0x129   :  { %v194_v35 = vpop.f32.mrb[1].mxu0  ;;  %v2821_v43 = vadd.f32 %v235_v39, %v100_v36  ;;  %v237_v44 = vpop.f32.mrb[1].mxu1  ;;  %v2827_v49 = vadd.f32 %v192_v34, %v92_v33 }
 0x12a   :  { %v196_v38 = vpop.f32.mrb[2].mxu0  ;;  %v2825_v46 = vadd.f32 %v237_v44, %v104_v40  ;;  %v239_v47 = vpop.f32.mrb[2].mxu1  ;;  %v2829_v50 = vadd.f32 %v194_v35, %v96_v37 }
 0x12b   :  { %v2819_v41 = vadd.f32 %v196_v38, %v92_v33  ;;  %v198_v42 = vpop.f32.mrb[3].mxu0  ;;  %v241_v48 = vpop.f32.mrb[3].mxu1  ;;  %v2831_v52 = vadd.f32 %v239_v47, %v100_v36  ;;  %v2859_v36 = vrot.slane %v2854_v30, 5 }
 0x12c   :  { %v2823_v45 = vadd.f32 %v198_v42, %v96_v37  ;;  %v2838_v57 = vadd.f32 %v241_v48, %v104_v40 }
 0x138   :  { %v340_v51 = vpop.f32.mrb[4].mxu0 }
 0x139   :  { %v347_v53 = vadd.f32 %v340_v51, %v2827_v49  ;;  %v342_v56 = vpop.f32.mrb[5].mxu0 }
 0x13a   :  { %v348_v58 = vadd.f32 %v342_v56, %v2829_v50  ;;  %v344_v59 = vpop.f32.mrb[6].mxu0  ;;  %v423_v60 = vpop.f32.mrb[4].mxu1 }
 0x13b   :  { %v438_v61 = vmul.f32 0.5, %v347_v53  ;;  %v432_v62 = vrot.slane %v423_v60, 5  ;;  %v345_v1 = vpop.f32.mrb[7].mxu0  ;;  %v425_v2 = vpop.f32.mrb[5].mxu1 }
 0x13c   :  { %v439_v3 = vmul.f32 %v348_v58, %v2836_v55  ;;  %v433_v4 = vrot.slane %v425_v2, 5  ;;  %v427_v6 = vpop.f32.mrb[6].mxu1 }
 0x13d   :  { %2365 = vtanh.f32 %v438_v61  ;;  %v436_v7 = vadd.f32 %v432_v62, %v2831_v52  ;;  %v428_v8 = vpop.f32.mrb[7].mxu1 }
 0x13e   :  { %2367 = vtanh.f32 %v439_v3  ;;  %v437_v9 = vadd.f32 %v433_v4, %v2838_v57 }
 0x13f   :  { %v461_v26 = vmul.f32 %v2842_v63, %v436_v7 }
 0x140   :  { %v462_v27 = vmul.f32 %v2846_v5, %v437_v9 }
 0x141   :  { %2369 = vtanh.f32 %v461_v26 }
 0x142   :  { %2371 = vtanh.f32 %v462_v27  ;;  %v2904_v27 = vrot.slane %v2654_v54, 7 }
 0x147   :  { %v2366_v28 = vpop.eup %2365 }
 0x148   :  { %v2368_v29 = vpop.eup %2367  ;;  %v442_v31 = vmul.f32 0.5, %v2366_v28 }
 0x149   :  { %v443_v32 = vmul.f32 %v2368_v29, %v2836_v55 }
 0x14a   :  { %v444_v33 = vadd.f32 0.5, %v442_v31  ;;  %v2907_v31 = vrot.slane %v2836_v55, 7 }
 0x14b   :  { %v2370_v34 = vpop.eup %2369  ;;  %v445_v35 = vadd.f32 %v443_v32, %v2854_v30 }
 0x14c   :  { %v2372_v37 = vpop.eup %2371  ;;  %v465_v38 = vmul.f32 %v2370_v34, %v2842_v63  ;;  %v446_v48 = vmul.f32 0.0, %v444_v33 }
 0x14d   :  { %v447_v39 = vmul.f32 %v445_v35, %v444_v33  ;;  %v466_v40 = vmul.f32 %v2372_v37, %v2846_v5 }
 0x14e   :  { %v470_v42 = vadd.f32 %v465_v38, %v2842_v63 }
 0x14f   :  { %449 = vrot.lane.b32.xlu0 %v447_v39, %s2647_s1  ;;  %v471_v44 = vadd.f32 %v2859_v36, %v466_v40 }
 0x150   :  { %v472_v56 = vmul.f32 0.0, %v470_v42 }
 0x151   :  { %v473_v47 = vmul.f32 %v471_v44, %v470_v42  ;;  %v2914_v42 = vrot.slane %v2654_v54, 6 }
 0x153   :  { %475 = vrot.lane.b32.xlu0 %v473_v47, %s2647_s1 }
 0x1c1   :  { %v450_v51 = vpop.permute.xlu0 %449 }
 0x1c2   :  { %v2867_v53 = vadd.f32 %v450_v51, %v446_v48  ;;  %v2917_v48 = vrot.slane %v2836_v55, 6 }
 0x1c4   :  { %2373 = vtanh.f32 %v2867_v53 }
 0x1c5   :  { %v476_v58 = vpop.permute.xlu0 %475 }
 0x1c6   :  { %v2870_v59 = vadd.f32 %v476_v58, %v472_v56 }
 0x1c8   :  { %2375 = vtanh.f32 %v2870_v59 }
 0x1ce   :  { %v2374_v60 = vpop.eup %2373 }
 0x1cf   :  { %v2873_v61 = vmul.f32 %v2374_v60, %v445_v35 }
 0x1d1   :  { %v481_v62 = vpack.c.bf16 %v2873_v61, %v2873_v61 }
 0x1d2   :  { %v2376_v1 = vpop.eup %2375 }
 0x1d3   :  { %483 = vrot.lane.b32.xlu1 %v481_v62, %s2647_s1  ;;  %v2878_v2 = vmul.f32 %v2376_v1, %v471_v44 }
 0x1d5   :  { %3593 = vst [vmem:[#allocation15_spill] sm:$0xff] %v2878_v2  ;;  %v537_v3 = vpack.c.bf16 %v2878_v2, %v2878_v2 }
 0x1d7   :  { %v539_v4 = vshrl.u32 %v537_v3, 16 }
 0x1d9   :  { %v541_v6 = vrot.slane %v539_v4, 1  ;;  %v2924_v4 = vrot.slane %v2854_v30, 7 }
 0x1db   :  { %542 = vrot.lane.b32.xlu1 %v541_v6, %s2647_s1 }
 0x245   :  { %v484_v7 = vpop.permute.xlu1 %483 }
 0x246   :  { %2293 = vmatmul.mubr.msk.bf16.vlgmr.msra.gmra.mrb[8].mxu0 %vm260_vm1, %v484_v7 }
 0x247   :  { %658 = vmatpush1.bf16.msra.mxu0 %v2746_v11  ;;  %689 = vmatprep.mubr.bf16.mxu0 %v3587_v0 }
 0x248   :  { %659 = vmatprep.subr.bf16.mxu0 %v2753_v14 }
 0x24b   :  { %660 = vmatpush1.bf16.msra.mxu0 %v2757_v15 }
 0x24c   :  { %661 = vmatprep.subr.bf16.mxu0 %v2763_v17 }
 0x24d   :  { %v543_v8 = vpop.permute.xlu1 %542 }
 0x24e   :  { %2294 = vmatmul.mubr.msk.bf16.vlgmr.msra.gmra.mrb[8].mxu1 %vm260_vm1, %v543_v8 }
 0x24f   :  { %662 = vmatpush1.bf16.msra.mxu0 %v2773_v20  ;;  %715 = vmatpush1.bf16.msra.mxu1 %v2750_v13 }
 0x250   :  { %663 = vmatprep.subr.bf16.mxu0 %v2776_v21  ;;  %716 = vmatprep.subr.bf16.mxu1 %v2759_v16 }
 0x251   :  { %746 = vmatprep.mubr.bf16.mxu1 %v3587_v0 }
 0x253   :  { %664 = vmatpush1.bf16.msra.mxu0 %v2785_v24  ;;  %717 = vmatpush1.bf16.msra.mxu1 %v2766_v18 }
 0x254   :  { %718 = vmatprep.subr.bf16.mxu1 %v2770_v19  ;;  %811 = vmatprep.subr.bf16.mxu0 %v2744_v10 }
 0x257   :  { %719 = vmatpush1.bf16.msra.mxu1 %v2779_v22 }
 0x258   :  { %720 = vmatprep.subr.bf16.mxu1 %v2782_v23 }
 0x25b   :  { %721 = vmatpush1.bf16.msra.mxu1 %v2789_v25 }
 0x25c   :  { %869 = vmatprep.subr.bf16.mxu1 %v2748_v12 }
 0x319   :  { %v522_v9 = vpop.f32.mrb[8].mxu0 }
 0x31a   :  { %v531_v26 = vrot.slane %v522_v9, 7  ;;  %v524_v28 = vpop.f32.mrb[9].mxu0  ;;  %v611_v9 = vrot.slane %v2867_v53, 7 }
 0x31b   :  { %v532_v29 = vrot.slane %v524_v28, 7  ;;  %v526_v32 = vpop.f32.mrb[10].mxu0 }
 0x31c   :  { %v535_v33 = vadd.f32 %v531_v26, %v2827_v49  ;;  %v527_v34 = vpop.f32.mrb[11].mxu0 }
 0x31d   :  { %v536_v35 = vadd.f32 %v532_v29, %v2829_v50  ;;  %v2933_v34 = vrot.slane %v2854_v30, 6 }
 0x31e   :  { %v600_v37 = vmul.f32 %v2904_v27, %v535_v33 }
 0x31f   :  { %v601_v38 = vmul.f32 %v2907_v31, %v536_v35 }
 0x320   :  { %2377 = vtanh.f32 %v600_v37 }
 0x321   :  { %2379 = vtanh.f32 %v601_v38  ;;  %v581_v39 = vpop.f32.mrb[8].mxu1 }
 0x322   :  { %v590_v40 = vrot.slane %v581_v39, 6  ;;  %v583_v44 = vpop.f32.mrb[9].mxu1  ;;  %v637_v39 = vrot.slane %v2870_v59, 1 }
 0x323   :  { %v591_v47 = vrot.slane %v583_v44, 6  ;;  %v585_v51 = vpop.f32.mrb[10].mxu1 }
 0x324   :  { %v594_v56 = vadd.f32 %v590_v40, %v2831_v52  ;;  %v586_v58 = vpop.f32.mrb[11].mxu1 }
 0x325   :  { %v595_v60 = vadd.f32 %v591_v47, %v2838_v57 }
 0x326   :  { %v626_v62 = vmul.f32 %v2914_v42, %v594_v56 }
 0x327   :  { %v627_v1 = vmul.f32 %v2917_v48, %v595_v60 }
 0x328   :  { %2381 = vtanh.f32 %v626_v62 }
 0x329   :  { %2383 = vtanh.f32 %v627_v1 }
 0x32a   :  { %v2378_v3 = vpop.eup %2377 }
 0x32b   :  { %v2380_v6 = vpop.eup %2379  ;;  %v604_v7 = vmul.f32 %v2378_v3, %v2904_v27 }
 0x32c   :  { %v605_v8 = vmul.f32 %v2380_v6, %v2907_v31 }
 0x32d   :  { %v608_v26 = vadd.f32 %v604_v7, %v2904_v27 }
 0x32e   :  { %v609_v28 = vadd.f32 %v2924_v4, %v605_v8 }
 0x32f   :  { %v613_v29 = vmul.f32 %v611_v9, %v608_v26 }
 0x330   :  { %v614_v32 = vmul.f32 %v609_v28, %v608_v26 }
 0x332   :  { %v2382_v33 = vpop.eup %2381  ;;  %616 = vrot.lane.b32.xlu0 %v614_v32, %s2647_s1 }
 0x333   :  { %v2384_v35 = vpop.eup %2383  ;;  %v630_v37 = vmul.f32 %v2382_v33, %v2914_v42 }
 0x334   :  { %v631_v38 = vmul.f32 %v2384_v35, %v2917_v48 }
 0x335   :  { %v634_v53 = vadd.f32 %v630_v37, %v2914_v42 }
 0x336   :  { %v635_v40 = vadd.f32 %v2933_v34, %v631_v38 }
 0x337   :  { %v639_v44 = vmul.f32 %v637_v39, %v634_v53 }
 0x338   :  { %v640_v47 = vmul.f32 %v635_v40, %v634_v53 }
 0x33a   :  { %642 = vrot.lane.b32.xlu1 %v640_v47, %s2647_s1 }
 0x3a4   :  { %v617_v51 = vpop.permute.xlu0 %616 }
 0x3a5   :  { %v2941_v56 = vadd.f32 %v617_v51, %v613_v29 }
 0x3a7   :  { %2385 = vtanh.f32 %v2941_v56 }
 0x3ac   :  { %v643_v58 = vpop.permute.xlu1 %642 }
 0x3ad   :  { %v2944_v60 = vadd.f32 %v643_v58, %v639_v44 }
 0x3af   :  { %2387 = vtanh.f32 %v2944_v60 }
 0x3b1   :  { %v2386_v62 = vpop.eup %2385 }
 0x3b2   :  { %v2947_v59 = vmul.f32 %v2386_v62, %v609_v28 }
 0x3b4   :  { %v648_v1 = vpack.c.bf16 %v2947_v59, %v2947_v59 }
 0x3b6   :  { %v650_v3 = vshrl.u32 %v648_v1, 16 }
 0x3b8   :  { %652 = vrot.lane.b32.xlu0 %v650_v3, %s2647_s1 }
 0x3b9   :  { %v2388_v6 = vpop.eup %2387 }
 0x3ba   :  { %v2952_v7 = vmul.f32 %v2388_v6, %v635_v40 }
 0x3bc   :  { %3594 = vst [vmem:[#allocation16_spill] sm:$0xff] %v2952_v7  ;;  %v706_v8 = vpack.c.bf16 %v2952_v7, %v2952_v7 }
 0x3be   :  { %v708_v9 = vrot.slane %v706_v8, 1 }
 0x3c0   :  { %709 = vrot.lane.b32.xlu1 %v708_v9, %s2647_s1 }
 0x42a   :  { %v653_v26 = vpop.permute.xlu0 %652 }
 0x42b   :  { %2295 = vmatmul.mubr.msk.bf16.vlgmr.msra.gmra.mrb[12].mxu0 %vm260_vm1, %v653_v26 }
 0x42c   :  { %812 = vmatpush1.bf16.msra.mxu0 %v2746_v11  ;;  %843 = vmatprep.mubr.bf16.mxu0 %v3587_v0 }
 0x42d   :  { %813 = vmatprep.subr.bf16.mxu0 %v2753_v14 }
 0x430   :  { %814 = vmatpush1.bf16.msra.mxu0 %v2757_v15 }
 0x431   :  { %815 = vmatprep.subr.bf16.mxu0 %v2763_v17 }
 0x432   :  { %v710_v28 = vpop.permute.xlu1 %709 }
 0x433   :  { %2296 = vmatmul.mubr.msk.bf16.vlgmr.msra.gmra.mrb[12].mxu1 %vm260_vm1, %v710_v28 }
 0x434   :  { %816 = vmatpush1.bf16.msra.mxu0 %v2773_v20  ;;  %870 = vmatpush1.bf16.msra.mxu1 %v2750_v13 }
 0x435   :  { %817 = vmatprep.subr.bf16.mxu0 %v2776_v21  ;;  %871 = vmatprep.subr.bf16.mxu1 %v2759_v16 }
 0x436   :  { %901 = vmatprep.mubr.bf16.mxu1 %v3587_v0 }
 0x438   :  { %818 = vmatpush1.bf16.msra.mxu0 %v2785_v24  ;;  %872 = vmatpush1.bf16.msra.mxu1 %v2766_v18 }
 0x439   :  { %873 = vmatprep.subr.bf16.mxu1 %v2770_v19  ;;  %962 = vmatprep.subr.bf16.mxu0 %v2744_v10 }
 0x43c   :  { %874 = vmatpush1.bf16.msra.mxu1 %v2779_v22 }
 0x43d   :  { %875 = vmatprep.subr.bf16.mxu1 %v2782_v23 }
 0x440   :  { %876 = vmatpush1.bf16.msra.mxu1 %v2789_v25 }
 0x441   :  { %1018 = vmatprep.subr.bf16.mxu1 %v2748_v12 }
 0x4fe   :  { %v691_v29 = vpop.f32.mrb[12].mxu0 }
 0x4ff   :  { %v700_v32 = vrot.slane %v691_v29, 6  ;;  %v693_v33 = vpop.f32.mrb[13].mxu0 }
 0x500   :  { %v701_v35 = vrot.slane %v693_v33, 6  ;;  %v695_v37 = vpop.f32.mrb[14].mxu0 }
 0x501   :  { %v704_v38 = vadd.f32 %v700_v32, %v2827_v49  ;;  %v696_v39 = vpop.f32.mrb[15].mxu0 }
 0x502   :  { %v705_v53 = vadd.f32 %v701_v35, %v2829_v50  ;;  %v772_v35 = vrot.slane %v2941_v56, 7 }
 0x503   :  { %v763_v40 = vmul.f32 %v704_v38, %v2914_v42 }
 0x504   :  { %v764_v44 = vmul.f32 %v705_v53, %v2917_v48 }
 0x505   :  { %2389 = vtanh.f32 %v763_v40 }
 0x506   :  { %2391 = vtanh.f32 %v764_v44  ;;  %v748_v47 = vpop.f32.mrb[12].mxu1 }
 0x507   :  { %v757_v51 = vrot.slane %v748_v47, 7  ;;  %v750_v58 = vpop.f32.mrb[13].mxu1 }
 0x508   :  { %v758_v62 = vrot.slane %v750_v58, 7  ;;  %v752_v1 = vpop.f32.mrb[14].mxu1  ;;  %v792_v58 = vrot.slane %v2944_v60, 1 }
 0x509   :  { %v761_v3 = vadd.f32 %v757_v51, %v2831_v52  ;;  %v753_v6 = vpop.f32.mrb[15].mxu1 }
 0x50a   :  { %v762_v8 = vadd.f32 %v758_v62, %v2838_v57 }
 0x50b   :  { %v783_v9 = vmul.f32 %v761_v3, %v2904_v27 }
 0x50c   :  { %v784_v26 = vmul.f32 %v762_v8, %v2907_v31 }
 0x50d   :  { %2393 = vtanh.f32 %v783_v9 }
 0x50e   :  { %2395 = vtanh.f32 %v784_v26 }
 0x50f   :  { %v2390_v28 = vpop.eup %2389 }
 0x510   :  { %v2392_v29 = vpop.eup %2391  ;;  %v767_v32 = vmul.f32 %v2390_v28, %v2914_v42 }
 0x511   :  { %v768_v33 = vmul.f32 %v2392_v29, %v2917_v48  ;;  %v2209_v29 = vsel %vm2208_vm2, %v2873_v61, %v2947_v59 }
 0x512   :  { %v769_v37 = vadd.f32 %v767_v32, %v2914_v42 }
 0x513   :  { %v770_v38 = vadd.f32 %v768_v33, %v2933_v34 }
 0x514   :  { %v774_v39 = vmul.f32 %v772_v35, %v769_v37 }
 0x515   :  { %v775_v53 = vmul.f32 %v770_v38, %v769_v37 }
 0x517   :  { %v2394_v40 = vpop.eup %2393  ;;  %777 = vrot.lane.b32.xlu0 %v775_v53, %s2647_s1 }
 0x518   :  { %v2396_v44 = vpop.eup %2395  ;;  %v787_v47 = vmul.f32 %v2394_v40, %v2904_v27 }
 0x519   :  { %v788_v51 = vmul.f32 %v2396_v44, %v2907_v31 }
 0x51a   :  { %v789_v62 = vadd.f32 %v787_v47, %v2904_v27 }
 0x51b   :  { %v790_v56 = vadd.f32 %v788_v51, %v2924_v4 }
 0x51c   :  { %v794_v1 = vmul.f32 %v792_v58, %v789_v62 }
 0x51d   :  { %v795_v3 = vmul.f32 %v790_v56, %v789_v62 }
 0x51f   :  { %797 = vrot.lane.b32.xlu1 %v795_v3, %s2647_s1 }
 0x589   :  { %v778_v6 = vpop.permute.xlu0 %777 }
 0x58a   :  { %v2997_v8 = vadd.f32 %v778_v6, %v774_v39 }
 0x58c   :  { %2397 = vtanh.f32 %v2997_v8 }
 0x591   :  { %v798_v9 = vpop.permute.xlu1 %797 }
 0x592   :  { %v3000_v26 = vadd.f32 %v798_v9, %v794_v1 }
 0x594   :  { %2399 = vtanh.f32 %v3000_v26 }
 0x596   :  { %v2398_v60 = vpop.eup %2397 }
 0x597   :  { %v782_v28 = vmul.f32 %v2398_v60, %v770_v38 }
 0x599   :  { %v803_v32 = vpack.c.bf16 %v782_v28, %v782_v28  ;;  %v3007_v33 = vsel %vm2210_vm3, %v2209_v29, %v782_v28 }
 0x59b   :  { %v805_v35 = vrot.slane %v803_v32, 1 }
 0x59d   :  { %806 = vrot.lane.b32.xlu0 %v805_v35, %s2647_s1 }
 0x59e   :  { %v2400_v37 = vpop.eup %2399 }
 0x59f   :  { %v3010_v39 = vmul.f32 %v2400_v37, %v790_v56 }
 0x5a1   :  { %v860_v53 = vpack.c.bf16 %v3010_v39, %v3010_v39 }
 0x5a3   :  { %v862_v40 = vshrl.u32 %v860_v53, 16 }
 0x5a5   :  { %864 = vrot.lane.b32.xlu1 %v862_v40, %s2647_s1 }
 0x60f   :  { %v807_v38 = vpop.permute.xlu0 %806 }
 0x610   :  { %2297 = vmatmul.mubr.msk.bf16.vlgmr.msra.gmra.mrb[16].mxu0 %vm260_vm1, %v807_v38 }
 0x611   :  { %963 = vmatpush1.bf16.msra.mxu0 %v2746_v11  ;;  %994 = vmatprep.mubr.bf16.mxu0 %v3587_v0 }
 0x612   :  { %964 = vmatprep.subr.bf16.mxu0 %v2753_v14 }
 0x615   :  { %965 = vmatpush1.bf16.msra.mxu0 %v2757_v15 }
 0x616   :  { %966 = vmatprep.subr.bf16.mxu0 %v2763_v17 }
 0x617   :  { %v865_v61 = vpop.permute.xlu1 %864 }
 0x618   :  { %2298 = vmatmul.mubr.msk.bf16.vlgmr.msra.gmra.mrb[16].mxu1 %vm260_vm1, %v865_v61 }
 0x619   :  { %1019 = vmatpush1.bf16.msra.mxu1 %v2750_v13  ;;  %967 = vmatpush1.bf16.msra.mxu0 %v2773_v20 }
 0x61a   :  { %1020 = vmatprep.subr.bf16.mxu1 %v2759_v16  ;;  %968 = vmatprep.subr.bf16.mxu0 %v2776_v21 }
 0x61b   :  { %1050 = vmatprep.mubr.bf16.mxu1 %v3587_v0 }
 0x61d   :  { %1021 = vmatpush1.bf16.msra.mxu1 %v2766_v18  ;;  %969 = vmatpush1.bf16.msra.mxu0 %v2785_v24 }
 0x61e   :  { %1022 = vmatprep.subr.bf16.mxu1 %v2770_v19  ;;  %1127 = vmatprep.subr.bf16.mxu0 %v2744_v10 }
 0x621   :  { %1023 = vmatpush1.bf16.msra.mxu1 %v2779_v22 }
 0x622   :  { %1024 = vmatprep.subr.bf16.mxu1 %v2782_v23 }
 0x625   :  { %1025 = vmatpush1.bf16.msra.mxu1 %v2789_v25 }
 0x626   :  { %1186 = vmatprep.subr.bf16.mxu1 %v2748_v12 }
 0x6e3   :  { %v845_v59 = vpop.f32.mrb[16].mxu0 }
 0x6e4   :  { %v854_v44 = vrot.slane %v845_v59, 5  ;;  %v847_v47 = vpop.f32.mrb[17].mxu0 }
 0x6e5   :  { %v855_v51 = vrot.slane %v847_v47, 5  ;;  %v849_v58 = vpop.f32.mrb[18].mxu0 }
 0x6e6   :  { %v858_v62 = vadd.f32 %v854_v44, %v2827_v49  ;;  %v850_v56 = vpop.f32.mrb[19].mxu0  ;;  %v921_v44 = vrot.slane %v2997_v8, 7 }
 0x6e7   :  { %v859_v1 = vadd.f32 %v855_v51, %v2829_v50 }
 0x6e8   :  { %v912_v3 = vmul.f32 %v858_v62, %v2842_v63 }
 0x6e9   :  { %v913_v6 = vmul.f32 %v859_v1, %v2846_v5 }
 0x6ea   :  { %2401 = vtanh.f32 %v912_v3  ;;  %v941_v3 = vrot.slane %v3000_v26, 1 }
 0x6eb   :  { %2403 = vtanh.f32 %v913_v6  ;;  %v903_v9 = vpop.f32.mrb[16].mxu1 }
 0x6ec   :  { %v910_v60 = vadd.f32 %v903_v9, %v2831_v52  ;;  %v905_v28 = vpop.f32.mrb[17].mxu1 }
 0x6ed   :  { %v911_v29 = vadd.f32 %v905_v28, %v2838_v57  ;;  %v907_v32 = vpop.f32.mrb[18].mxu1 }
 0x6ee   :  { %v932_v35 = vmul.f32 0.5, %v910_v60  ;;  %v908_v37 = vpop.f32.mrb[19].mxu1 }
 0x6ef   :  { %v933_v53 = vmul.f32 %v911_v29, %v2836_v55 }
 0x6f0   :  { %2405 = vtanh.f32 %v932_v35 }
 0x6f1   :  { %2407 = vtanh.f32 %v933_v53 }
 0x6f4   :  { %v2402_v40 = vpop.eup %2401 }
 0x6f5   :  { %v2404_v38 = vpop.eup %2403  ;;  %v916_v61 = vmul.f32 %v2402_v40, %v2842_v63 }
 0x6f6   :  { %v917_v59 = vmul.f32 %v2404_v38, %v2846_v5 }
 0x6f7   :  { %v918_v52 = vadd.f32 %v916_v61, %v2842_v63 }
 0x6f8   :  { %v919_v47 = vadd.f32 %v917_v59, %v2859_v36 }
 0x6f9   :  { %v923_v57 = vmul.f32 %v921_v44, %v918_v52 }
 0x6fa   :  { %v2406_v51 = vpop.eup %2405  ;;  %v924_v58 = vmul.f32 %v919_v47, %v918_v52 }
 0x6fb   :  { %v2408_v62 = vpop.eup %2407  ;;  %v936_v56 = vmul.f32 0.5, %v2406_v51  ;;  %v3089_v51 = vrot.slane %v2654_v54, 4 }
 0x6fc   :  { %926 = vrot.lane.b32.xlu0 %v924_v58, %s2647_s1  ;;  %v937_v1 = vmul.f32 %v2408_v62, %v2836_v55 }
 0x6fd   :  { %v938_v6 = vadd.f32 0.5, %v936_v56  ;;  %v3092_v56 = vrot.slane %v2836_v55, 4 }
 0x6fe   :  { %v939_v9 = vadd.f32 %v937_v1, %v2854_v30 }
 0x6ff   :  { %v943_v60 = vmul.f32 %v941_v3, %v938_v6 }
 0x700   :  { %v944_v8 = vmul.f32 %v939_v9, %v938_v6 }
 0x702   :  { %946 = vrot.lane.b32.xlu1 %v944_v8, %s2647_s1 }
 0x76e   :  { %v927_v28 = vpop.permute.xlu0 %926 }
 0x76f   :  { %v3052_v29 = vadd.f32 %v927_v28, %v923_v57 }
 0x771   :  { %2409 = vtanh.f32 %v3052_v29 }
 0x774   :  { %v947_v32 = vpop.permute.xlu1 %946 }
 0x775   :  { %v3055_v35 = vadd.f32 %v947_v32, %v943_v60  ;;  %v3100_v32 = vrot.slane %v2836_v55, 1 }
 0x777   :  { %2411 = vtanh.f32 %v3055_v35 }
 0x77b   :  { %v2410_v37 = vpop.eup %2409 }
 0x77c   :  { %v931_v26 = vmul.f32 %v2410_v37, %v919_v47 }
 0x77e   :  { %v952_v53 = vpack.c.bf16 %v931_v26, %v931_v26  ;;  %v3060_v40 = vsel %vm2212_vm4, %v3007_v33, %v931_v26 }
 0x780   :  { %v954_v38 = vshrl.u32 %v952_v53, 16 }
 0x781   :  { %v2412_v61 = vpop.eup %2411 }
 0x782   :  { %v956_v59 = vrot.slane %v954_v38, 1  ;;  %v3062_v44 = vmul.f32 %v2412_v61, %v939_v9 }
 0x784   :  { %957 = vrot.lane.b32.xlu0 %v956_v59, %s2647_s1  ;;  %v1011_v52 = vpack.c.bf16 %v3062_v44, %v3062_v44 }
 0x786   :  { %1013 = vrot.lane.b32.xlu1 %v1011_v52, %s2647_s1 }
 0x7f6   :  { %v958_v57 = vpop.permute.xlu0 %957 }
 0x7f7   :  { %2299 = vmatmul.mubr.msk.bf16.vlgmr.msra.gmra.mrb[20].mxu0 %vm260_vm1, %v958_v57 }
 0x7f8   :  { %v1014_v47 = vpop.permute.xlu1 %1013  ;;  %1128 = vmatpush1.bf16.msra.mxu0 %v2746_v11  ;;  %1159 = vmatprep.mubr.bf16.mxu0 %v3587_v0 }
 0x7f9   :  { %2300 = vmatmul.mubr.msk.bf16.vlgmr.msra.gmra.mrb[20].mxu1 %vm260_vm1, %v1014_v47  ;;  %1129 = vmatprep.subr.bf16.mxu0 %v2753_v14 }
 0x7fa   :  { %1187 = vmatpush1.bf16.msra.mxu1 %v2750_v13  ;;  %1218 = vmatprep.mubr.bf16.mxu1 %v3587_v0 }
 0x7fb   :  { %1188 = vmatprep.subr.bf16.mxu1 %v2759_v16 }
 0x7fc   :  { %1130 = vmatpush1.bf16.msra.mxu0 %v2757_v15 }
 0x7fd   :  { %1131 = vmatprep.subr.bf16.mxu0 %v2763_v17 }
 0x7fe   :  { %1189 = vmatpush1.bf16.msra.mxu1 %v2766_v18 }
 0x7ff   :  { %1190 = vmatprep.subr.bf16.mxu1 %v2770_v19 }
 0x800   :  { %1132 = vmatpush1.bf16.msra.mxu0 %v2773_v20 }
 0x801   :  { %1133 = vmatprep.subr.bf16.mxu0 %v2776_v21 }
 0x802   :  { %1191 = vmatpush1.bf16.msra.mxu1 %v2779_v22 }
 0x803   :  { %1192 = vmatprep.subr.bf16.mxu1 %v2782_v23 }
 0x804   :  { %1134 = vmatpush1.bf16.msra.mxu0 %v2785_v24 }
 0x805   :  { %1297 = vmatprep.subr.bf16.mxu0 %v2744_v10  ;;  %v3096_v10 = vrot.slane %v2654_v54, 1 }
 0x806   :  { %1193 = vmatpush1.bf16.msra.mxu1 %v2789_v25 }
 0x807   :  { %1354 = vmatprep.subr.bf16.mxu1 %v2748_v12 }
 0x8ca   :  { %v996_v13 = vpop.f32.mrb[20].mxu0 }
 0x8cb   :  { %v1005_v33 = vrot.slane %v996_v13, 4  ;;  %v998_v58 = vpop.f32.mrb[21].mxu0  ;;  %v3585_v13 = vrot.slane %v2854_v30, 4 }
 0x8cc   :  { %v1006_v62 = vrot.slane %v998_v58, 4  ;;  %v1000_v1 = vpop.f32.mrb[22].mxu0  ;;  %v1052_v3 = vpop.f32.mrb[20].mxu1 }
 0x8cd   :  { %v1009_v6 = vadd.f32 %v1005_v33, %v2827_v49  ;;  %v1061_v9 = vrot.slane %v1052_v3, 1  ;;  %v1001_v60 = vpop.f32.mrb[23].mxu0  ;;  %v1054_v12 = vpop.f32.mrb[21].mxu1  ;;  %v3586_v3 = vrot.slane %v2854_v30, 1 }
 0x8ce   :  { %v1010_v8 = vadd.f32 %v1006_v62, %v2829_v50  ;;  %v1062_v28 = vrot.slane %v1054_v12, 1  ;;  %v1056_v37 = vpop.f32.mrb[22].mxu1 }
 0x8cf   :  { %v1071_v26 = vmul.f32 %v3089_v51, %v1009_v6  ;;  %v1065_v53 = vadd.f32 %v1061_v9, %v2821_v43  ;;  %v1057_v38 = vpop.f32.mrb[23].mxu1  ;;  %v1082_v9 = vrot.slane %v3052_v29, 7  ;;  %v1108_v37 = vrot.slane %v3055_v35, 1 }
 0x8d0   :  { %v1072_v61 = vmul.f32 %v3092_v56, %v1010_v8  ;;  %v1066_v59 = vadd.f32 %v1062_v28, %v2825_v46 }
 0x8d1   :  { %2413 = vtanh.f32 %v1071_v26  ;;  %v1097_v52 = vmul.f32 %v3096_v10, %v1065_v53 }
 0x8d2   :  { %2415 = vtanh.f32 %v1072_v61  ;;  %v1098_v57 = vmul.f32 %v3100_v32, %v1066_v59 }
 0x8d3   :  { %2417 = vtanh.f32 %v1097_v52 }
 0x8d4   :  { %2419 = vtanh.f32 %v1098_v57 }
 0x8db   :  { %v2414_v47 = vpop.eup %2413 }
 0x8dc   :  { %v2416_v33 = vpop.eup %2415  ;;  %v1075_v58 = vmul.f32 %v2414_v47, %v3089_v51 }
 0x8dd   :  { %v2418_v62 = vpop.eup %2417  ;;  %v1076_v1 = vmul.f32 %v2416_v33, %v3092_v56 }
 0x8de   :  { %v2420_v6 = vpop.eup %2419  ;;  %v1079_v60 = vadd.f32 %v1075_v58, %v3089_v51  ;;  %v1101_v12 = vmul.f32 %v2418_v62, %v3096_v10 }
 0x8df   :  { %v1080_v8 = vadd.f32 %v3585_v13, %v1076_v1  ;;  %v1102_v28 = vmul.f32 %v2420_v6, %v3100_v32 }
 0x8e0   :  { %v1105_v26 = vadd.f32 %v1101_v12, %v3096_v10  ;;  %v1084_v53 = vmul.f32 %v1082_v9, %v1079_v60 }
 0x8e1   :  { %v1085_v38 = vmul.f32 %v1080_v8, %v1079_v60  ;;  %v1106_v61 = vadd.f32 %v3586_v3, %v1102_v28 }
 0x8e2   :  { %v1110_v59 = vmul.f32 %v1108_v37, %v1105_v26 }
 0x8e3   :  { %1087 = vrot.lane.b32.xlu0 %v1085_v38, %s2647_s1  ;;  %v1111_v29 = vmul.f32 %v1106_v61, %v1105_v26 }
 0x8e5   :  { %1113 = vrot.lane.b32.xlu1 %v1111_v29, %s2647_s1 }
 0x955   :  { %v1088_v52 = vpop.permute.xlu0 %1087 }
 0x956   :  { %v3124_v57 = vadd.f32 %v1088_v52, %v1084_v53 }
 0x957   :  { %v1114_v47 = vpop.permute.xlu1 %1113 }
 0x958   :  { %2421 = vtanh.f32 %v3124_v57  ;;  %v3127_v35 = vadd.f32 %v1114_v47, %v1110_v59  ;;  %v3180_v47 = vrot.slane %v2836_v55, 2 }
 0x95a   :  { %2423 = vtanh.f32 %v3127_v35 }
 0x962   :  { %v2422_v33 = vpop.eup %2421 }
 0x963   :  { %v1092_v58 = vmul.f32 %v2422_v33, %v1080_v8  ;;  %v3145_v8 = vld [vmem:[#allocation8] ss:$8 sps:$4 sm:$0xff]  }
 0x964   :  { %v2424_v62 = vpop.eup %2423 }
 0x965   :  { %v1119_v1 = vpack.c.bf16 %v1092_v58, %v1092_v58  ;;  %v3130_v6 = vmul.f32 %v2424_v62, %v1106_v61  ;;  %v3134_v9 = vsel %vm2214_vm5, %v3060_v40, %v1092_v58  ;;  %v3176_v61 = vrot.slane %v2654_v54, 2 }
 0x967   :  { %v1121_v60 = vrot.slane %v1119_v1, 2  ;;  %v1176_v12 = vpack.c.bf16 %v3130_v6, %v3130_v6 }
 0x969   :  { %1122 = vrot.lane.b32.xlu0 %v1121_v60, %s2647_s1  ;;  %v1178_v28 = vshrl.u32 %v1176_v12, 16 }
 0x96b   :  { %v1180_v37 = vrot.slane %v1178_v28, 3  ;;  %v3589_v28 = vrot.slane %v2854_v30, 3 }
 0x96d   :  { %1181 = vrot.lane.b32.xlu1 %v1180_v37, %s2647_s1 }
 0x9db   :  { %v1123_v26 = vpop.permute.xlu0 %1122 }
 0x9dc   :  { %2301 = vmatmul.mubr.msk.bf16.vlgmr.msra.gmra.mrb[24].mxu0 %vm260_vm1, %v1123_v26 }
 0x9dd   :  { %1298 = vmatpush1.bf16.msra.mxu0 %v2746_v11  ;;  %1329 = vmatprep.mubr.bf16.mxu0 %v3587_v0  ;;  %v3159_v11 = vld [vmem:[#allocation7 + $0x4] ss:$8 sps:$4 sm:$0xff]  }
 0x9de   :  { %1299 = vmatprep.subr.bf16.mxu0 %v2753_v14  ;;  %v3163_v14 = vld [vmem:[#allocation8 + $0x4] ss:$8 sps:$4 sm:$0xff]  }
 0x9df   :  { %v1182_v40 = vpop.permute.xlu1 %1181 }
 0x9e0   :  { %2302 = vmatmul.mubr.msk.bf16.vlgmr.msra.gmra.mrb[24].mxu1 %vm260_vm1, %v1182_v40 }
 0x9e1   :  { %1355 = vmatpush1.bf16.msra.mxu1 %v3145_v8  ;;  %1300 = vmatpush1.bf16.msra.mxu0 %v2757_v15 }
 0x9e2   :  { %1356 = vmatprep.subr.bf16.mxu1 %v2759_v16  ;;  %1301 = vmatprep.subr.bf16.mxu0 %v2763_v17  ;;  %v3167_v17 = vrot.slane %v2654_v54, 3 }
 0x9e3   :  { %1386 = vmatprep.mubr.bf16.mxu1 %v3587_v0 }
 0x9e5   :  { %1357 = vmatpush1.bf16.msra.mxu1 %v2766_v18  ;;  %1302 = vmatpush1.bf16.msra.mxu0 %v2773_v20  ;;  %v3170_v20 = vrot.slane %v2836_v55, 3 }
 0x9e6   :  { %1358 = vmatprep.subr.bf16.mxu1 %v2770_v19  ;;  %1303 = vmatprep.subr.bf16.mxu0 %v2776_v21 }
 0x9e9   :  { %1359 = vmatpush1.bf16.msra.mxu1 %v2779_v22  ;;  %1304 = vmatpush1.bf16.msra.mxu0 %v2785_v24 }
 0x9ea   :  { %1360 = vmatprep.subr.bf16.mxu1 %v2782_v23  ;;  %1451 = vmatprep.subr.bf16.mxu0 %v3159_v11 }
 0x9ed   :  { %1361 = vmatpush1.bf16.msra.mxu1 %v2789_v25 }
 0x9ee   :  { %1510 = vmatprep.subr.bf16.mxu1 %v3163_v14 }
 0xaaf   :  { %v1161_v15 = vpop.f32.mrb[24].mxu0 }
 0xab0   :  { %v1170_v16 = vrot.slane %v1161_v15, 3  ;;  %v1163_v18 = vpop.f32.mrb[25].mxu0  ;;  %v1250_v15 = vrot.slane %v3124_v57, 7 }
 0xab1   :  { %v1171_v19 = vrot.slane %v1163_v18, 3  ;;  %v1165_v21 = vpop.f32.mrb[26].mxu0 }
 0xab2   :  { %v1174_v22 = vadd.f32 %v1170_v16, %v2827_v49  ;;  %v1166_v23 = vpop.f32.mrb[27].mxu0  ;;  %v3590_v21 = vrot.slane %v2854_v30, 2 }
 0xab3   :  { %v1175_v24 = vadd.f32 %v1171_v19, %v2829_v50  ;;  %v1220_v25 = vpop.f32.mrb[24].mxu1 }
 0xab4   :  { %v1239_v53 = vmul.f32 %v3167_v17, %v1174_v22  ;;  %v1229_v38 = vrot.slane %v1220_v25, 2  ;;  %v1222_v59 = vpop.f32.mrb[25].mxu1 }
 0xab5   :  { %v1240_v29 = vmul.f32 %v3170_v20, %v1175_v24  ;;  %v1230_v52 = vrot.slane %v1222_v59, 2  ;;  %v1224_v33 = vpop.f32.mrb[26].mxu1 }
 0xab6   :  { %2425 = vtanh.f32 %v1239_v53  ;;  %v1233_v58 = vadd.f32 %v1229_v38, %v2821_v43  ;;  %v1225_v62 = vpop.f32.mrb[27].mxu1  ;;  %v1276_v38 = vrot.slane %v3127_v35, 1 }
 0xab7   :  { %2427 = vtanh.f32 %v1240_v29  ;;  %v1234_v1 = vadd.f32 %v1230_v52, %v2825_v46 }
 0xab8   :  { %v1265_v60 = vmul.f32 %v3176_v61, %v1233_v58 }
 0xab9   :  { %v1266_v54 = vmul.f32 %v3180_v47, %v1234_v1 }
 0xaba   :  { %2429 = vtanh.f32 %v1265_v60 }
 0xabb   :  { %2431 = vtanh.f32 %v1266_v54 }
 0xac0   :  { %v2426_v12 = vpop.eup %2425 }
 0xac1   :  { %v2428_v37 = vpop.eup %2427  ;;  %v1243_v26 = vmul.f32 %v2426_v12, %v3167_v17 }
 0xac2   :  { %v1244_v40 = vmul.f32 %v2428_v37, %v3170_v20 }
 0xac3   :  { %v1247_v16 = vadd.f32 %v1243_v26, %v3167_v17 }
 0xac4   :  { %v2430_v18 = vpop.eup %2429  ;;  %v1248_v19 = vadd.f32 %v3589_v28, %v1244_v40 }
 0xac5   :  { %v2432_v22 = vpop.eup %2431  ;;  %v1269_v23 = vmul.f32 %v2430_v18, %v3176_v61  ;;  %v1252_v24 = vmul.f32 %v1250_v15, %v1247_v16 }
 0xac6   :  { %v1253_v25 = vmul.f32 %v1248_v19, %v1247_v16  ;;  %v1270_v53 = vmul.f32 %v2432_v22, %v3180_v47 }
 0xac7   :  { %v1273_v59 = vadd.f32 %v1269_v23, %v3176_v61  ;;  %v3219_v23 = vld [vmem:[#allocation7] ss:$8 sps:$4 sm:$0xff]  }
 0xac8   :  { %1255 = vrot.lane.b32.xlu0 %v1253_v25, %s2647_s1  ;;  %v1274_v57 = vadd.f32 %v3590_v21, %v1270_v53  ;;  %v3232_v25 = vld [vmem:[#allocation7 + $0x10] ss:$8 sps:$4 sm:$0xff]   ;;  %v3235_v53 = vld [vmem:[#allocation7 + $0x24] ss:$8 sps:$4 sm:$0xff]  }
 0xac9   :  { %v1278_v29 = vmul.f32 %v1276_v38, %v1273_v59  ;;  %v3238_v38 = vld [vmem:[#allocation8 + $0x10] ss:$8 sps:$4 sm:$0xff]  }
 0xaca   :  { %v1279_v52 = vmul.f32 %v1274_v57, %v1273_v59  ;;  %v3241_v59 = vld [vmem:[#allocation8 + $0x24] ss:$8 sps:$4 sm:$0xff]  }
 0xacc   :  { %1281 = vrot.lane.b32.xlu1 %v1279_v52, %s2647_s1  ;;  %v3250_v52 = vld [vmem:[#allocation8 + $0x20] ss:$8 sps:$4 sm:$0xff]  }
 0xb3a   :  { %v1256_v33 = vpop.permute.xlu0 %1255 }
 0xb3b   :  { %v3202_v58 = vadd.f32 %v1256_v33, %v1252_v24  ;;  %v3229_v24 = vld [vmem:[#allocation8 + $0x14] ss:$8 sps:$4 sm:$0xff]  }
 0xb3c   :  { %v3253_v33 = vld [vmem:[#allocation8 + $0x34] ss:$8 sps:$4 sm:$0xff]  }
 0xb3d   :  { %2433 = vtanh.f32 %v3202_v58 }
 0xb3e   :  { %v1282_v62 = vpop.permute.xlu1 %1281 }
 0xb3f   :  { %v3205_v1 = vadd.f32 %v1282_v62, %v1278_v29  ;;  %v3247_v29 = vld [vmem:[#allocation7 + $0x34] ss:$8 sps:$4 sm:$0xff]   ;;  %v3256_v62 = vld [vmem:[#allocation7 + $0x30] ss:$8 sps:$4 sm:$0xff]  }
 0xb41   :  { %2435 = vtanh.f32 %v3205_v1 }
 0xb47   :  { %v2434_v35 = vpop.eup %2433 }
 0xb48   :  { %v1260_v60 = vmul.f32 %v2434_v35, %v1248_v19  ;;  %v3260_v35 = vld [vmem:[#allocation8 + $0x30] ss:$8 sps:$4 sm:$0xff]  }
 0xb4a   :  { %v1287_v54 = vpack.c.bf16 %v1260_v60, %v1260_v60  ;;  %v3210_v12 = vsel %vm2216_vm6, %v3134_v9, %v1260_v60  ;;  %v3224_v9 = vld [vmem:[#allocation7 + $0x14] ss:$8 sps:$4 sm:$0xff]  }
 0xb4b   :  { %v2436_v37 = vpop.eup %2435 }
 0xb4c   :  { %v1289_v26 = vshrl.u32 %v1287_v54, 16  ;;  %v3212_v40 = vmul.f32 %v2436_v37, %v1274_v57  ;;  %v3244_v57 = vld [vmem:[#allocation7 + $0x20] ss:$8 sps:$4 sm:$0xff]  }
 0xb4e   :  { %v1291_v15 = vrot.slane %v1289_v26, 2  ;;  %v1346_v16 = vpack.c.bf16 %v3212_v40, %v3212_v40 }
 0xb50   :  { %1292 = vrot.lane.b32.xlu0 %v1291_v15, %s2647_s1  ;;  %v1348_v18 = vrot.slane %v1346_v16, 3 }
 0xb52   :  { %1349 = vrot.lane.b32.xlu1 %v1348_v18, %s2647_s1 }
 0xbc2   :  { %v1293_v22 = vpop.permute.xlu0 %1292 }
 0xbc3   :  { %2303 = vmatmul.mubr.msk.bf16.vlgmr.msra.gmra.mrb[28].mxu0 %vm260_vm1, %v1293_v22 }
 0xbc4   :  { %v1350_v19 = vpop.permute.xlu1 %1349  ;;  %1452 = vmatpush1.bf16.msra.mxu0 %v3219_v23  ;;  %1483 = vmatprep.mubr.bf16.mxu0 %v3587_v0 }
 0xbc5   :  { %2304 = vmatmul.mubr.msk.bf16.vlgmr.msra.gmra.mrb[28].mxu1 %vm260_vm1, %v1350_v19  ;;  %1453 = vmatprep.subr.bf16.mxu0 %v3224_v9 }
 0xbc6   :  { %1511 = vmatpush1.bf16.msra.mxu1 %v3145_v8  ;;  %1542 = vmatprep.mubr.bf16.mxu1 %v3587_v0 }
 0xbc7   :  { %1512 = vmatprep.subr.bf16.mxu1 %v3229_v24 }
 0xbc8   :  { %1454 = vmatpush1.bf16.msra.mxu0 %v3232_v25 }
 0xbc9   :  { %1455 = vmatprep.subr.bf16.mxu0 %v3235_v53 }
 0xbca   :  { %1513 = vmatpush1.bf16.msra.mxu1 %v3238_v38 }
 0xbcb   :  { %1514 = vmatprep.subr.bf16.mxu1 %v3241_v59 }
 0xbcc   :  { %1456 = vmatpush1.bf16.msra.mxu0 %v3244_v57 }
 0xbcd   :  { %1457 = vmatprep.subr.bf16.mxu0 %v3247_v29 }
 0xbce   :  { %1515 = vmatpush1.bf16.msra.mxu1 %v3250_v52 }
 0xbcf   :  { %1516 = vmatprep.subr.bf16.mxu1 %v3253_v33 }
 0xbd0   :  { %1458 = vmatpush1.bf16.msra.mxu0 %v3256_v62 }
 0xbd1   :  { %1609 = vmatprep.subr.bf16.mxu0 %v3159_v11 }
 0xbd2   :  { %1517 = vmatpush1.bf16.msra.mxu1 %v3260_v35 }
 0xbd3   :  { %1660 = vmatprep.subr.bf16.mxu1 %v3163_v14 }
 0xc96   :  { %v1331_v60 = vpop.f32.mrb[28].mxu0 }
 0xc97   :  { %v1340_v54 = vrot.slane %v1331_v60, 2  ;;  %v1333_v37 = vpop.f32.mrb[29].mxu0 }
 0xc98   :  { %v1341_v26 = vrot.slane %v1333_v37, 2  ;;  %v1335_v15 = vpop.f32.mrb[30].mxu0  ;;  %v1388_v16 = vpop.f32.mrb[28].mxu1 }
 0xc99   :  { %v1344_v18 = vadd.f32 %v1340_v54, %v2827_v49  ;;  %v1397_v22 = vrot.slane %v1388_v16, 3  ;;  %v1336_v19 = vpop.f32.mrb[31].mxu0  ;;  %v1390_v13 = vpop.f32.mrb[29].mxu1 }
 0xc9a   :  { %v1345_v3 = vadd.f32 %v1341_v26, %v2829_v50  ;;  %v1398_v0 = vrot.slane %v1390_v13, 3  ;;  %v1392_v28 = vpop.f32.mrb[30].mxu1 }
 0xc9b   :  { %v1403_v21 = vmul.f32 %v1344_v18, %v3176_v61  ;;  %v1401_v2 = vadd.f32 %v1397_v22, %v2821_v43  ;;  %v1393_v7 = vpop.f32.mrb[31].mxu1 }
 0xc9c   :  { %v1404_v60 = vmul.f32 %v1345_v3, %v3180_v47  ;;  %v1402_v37 = vadd.f32 %v1398_v0, %v2825_v46  ;;  %v1412_v3 = vrot.slane %v3202_v58, 7 }
 0xc9d   :  { %2437 = vtanh.f32 %v1403_v21  ;;  %v1423_v15 = vmul.f32 %v1401_v2, %v3167_v17  ;;  %v3595_v2 = vrot.slane %v2854_v30, 2 }
 0xc9e   :  { %2439 = vtanh.f32 %v1404_v60  ;;  %v1424_v54 = vmul.f32 %v1402_v37, %v3170_v20  ;;  %v1432_v60 = vrot.slane %v3205_v1, 1 }
 0xc9f   :  { %2441 = vtanh.f32 %v1423_v15 }
 0xca0   :  { %2443 = vtanh.f32 %v1424_v54 }
 0xca7   :  { %v2438_v26 = vpop.eup %2437 }
 0xca8   :  { %v2440_v13 = vpop.eup %2439  ;;  %v1407_v28 = vmul.f32 %v2438_v26, %v3176_v61 }
 0xca9   :  { %v2442_v16 = vpop.eup %2441  ;;  %v1408_v18 = vmul.f32 %v2440_v13, %v3180_v47  ;;  %v3596_v47 = vrot.slane %v2854_v30, 3 }
 0xcaa   :  { %v2444_v7 = vpop.eup %2443  ;;  %v1409_v0 = vadd.f32 %v1407_v28, %v3176_v61  ;;  %v1427_v21 = vmul.f32 %v2442_v16, %v3167_v17 }
 0xcab   :  { %v1410_v22 = vadd.f32 %v1408_v18, %v3595_v2  ;;  %v1428_v19 = vmul.f32 %v2444_v7, %v3170_v20 }
 0xcac   :  { %v1429_v37 = vadd.f32 %v1427_v21, %v3167_v17  ;;  %v1414_v15 = vmul.f32 %v1412_v3, %v1409_v0 }
 0xcad   :  { %v1415_v54 = vmul.f32 %v1410_v22, %v1409_v0  ;;  %v1430_v26 = vadd.f32 %v1428_v19, %v3596_v47 }
 0xcae   :  { %v1434_v13 = vmul.f32 %v1432_v60, %v1429_v37 }
 0xcaf   :  { %1417 = vrot.lane.b32.xlu0 %v1415_v54, %s2647_s1  ;;  %v1435_v61 = vmul.f32 %v1430_v26, %v1429_v37 }
 0xcb1   :  { %1437 = vrot.lane.b32.xlu1 %v1435_v61, %s2647_s1 }
 0xd21   :  { %v1418_v58 = vpop.permute.xlu0 %1417 }
 0xd22   :  { %v3286_v28 = vadd.f32 %v1418_v58, %v1414_v15 }
 0xd23   :  { %v1438_v16 = vpop.permute.xlu1 %1437 }
 0xd24   :  { %2445 = vtanh.f32 %v3286_v28  ;;  %v3289_v20 = vadd.f32 %v1438_v16, %v1434_v13 }
 0xd26   :  { %2447 = vtanh.f32 %v3289_v20 }
 0xd2e   :  { %v2446_v17 = vpop.eup %2445 }
 0xd2f   :  { %v1422_v1 = vmul.f32 %v2446_v17, %v1410_v22  ;;  %v3597_v22 = vmov 0  }
 0xd30   :  { %v2448_v18 = vpop.eup %2447 }
 0xd31   :  { %v1443_v7 = vpack.c.bf16 %v1422_v1, %v1422_v1  ;;  %v3292_v3 = vmul.f32 %v2448_v18, %v1430_v26  ;;  %v3296_v0 = vsel %vm2218_vm7, %v3210_v12, %v1422_v1 }
 0xd33   :  { %v1445_v21 = vrot.slane %v1443_v7, 3  ;;  %v1500_v2 = vpack.c.bf16 %v3292_v3, %v3292_v3 }
 0xd35   :  { %1446 = vrot.lane.b32.xlu0 %v1445_v21, %s2647_s1  ;;  %v1502_v19 = vshrl.u32 %v1500_v2, 16 }
 0xd37   :  { %v1504_v60 = vrot.slane %v1502_v19, 2 }
 0xd39   :  { %1505 = vrot.lane.b32.xlu1 %v1504_v60, %s2647_s1 }
 0xda7   :  { %v1447_v37 = vpop.permute.xlu0 %1446 }
 0xda8   :  { %2305 = vmatmul.mubr.msk.bf16.vlgmr.msra.gmra.mrb[32].mxu0 %vm260_vm1, %v1447_v37 }
 0xda9   :  { %1610 = vmatpush1.bf16.msra.mxu0 %v3219_v23  ;;  %1641 = vmatprep.mubr.bf16.mxu0 %v3597_v22 }
 0xdaa   :  { %1611 = vmatprep.subr.bf16.mxu0 %v3224_v9 }
 0xdab   :  { %v1506_v12 = vpop.permute.xlu1 %1505 }
 0xdac   :  { %2306 = vmatmul.mubr.msk.bf16.vlgmr.msra.gmra.mrb[32].mxu1 %vm260_vm1, %v1506_v12 }
 0xdad   :  { %1661 = vmatpush1.bf16.msra.mxu1 %v3145_v8  ;;  %1612 = vmatpush1.bf16.msra.mxu0 %v3232_v25 }
 0xdae   :  { %1662 = vmatprep.subr.bf16.mxu1 %v3229_v24  ;;  %1613 = vmatprep.subr.bf16.mxu0 %v3235_v53 }
 0xdaf   :  { %1692 = vmatprep.mubr.bf16.mxu1 %v3597_v22 }
 0xdb1   :  { %1663 = vmatpush1.bf16.msra.mxu1 %v3238_v38  ;;  %1614 = vmatpush1.bf16.msra.mxu0 %v3244_v57 }
 0xdb2   :  { %1664 = vmatprep.subr.bf16.mxu1 %v3241_v59  ;;  %1615 = vmatprep.subr.bf16.mxu0 %v3247_v29 }
 0xdb5   :  { %1665 = vmatpush1.bf16.msra.mxu1 %v3250_v52  ;;  %1616 = vmatpush1.bf16.msra.mxu0 %v3256_v62 }
 0xdb6   :  { %1666 = vmatprep.subr.bf16.mxu1 %v3253_v33  ;;  %1756 = vmatprep.subr.bf16.mxu0 %v3159_v11 }
 0xdb9   :  { %1667 = vmatpush1.bf16.msra.mxu1 %v3260_v35 }
 0xdba   :  { %1815 = vmatprep.subr.bf16.mxu1 %v3163_v14 }
 0xe7b   :  { %v1485_v15 = vpop.f32.mrb[32].mxu0 }
 0xe7c   :  { %v1494_v54 = vrot.slane %v1485_v15, 1  ;;  %v1487_v47 = vpop.f32.mrb[33].mxu0 }
 0xe7d   :  { %v1495_v26 = vrot.slane %v1487_v47, 1  ;;  %v1489_v13 = vpop.f32.mrb[34].mxu0 }
 0xe7e   :  { %v1498_v61 = vadd.f32 %v1494_v54, %v2827_v49  ;;  %v1490_v58 = vpop.f32.mrb[35].mxu0  ;;  %v1568_v13 = vrot.slane %v3286_v28, 7 }
 0xe7f   :  { %v1499_v16 = vadd.f32 %v1495_v26, %v2829_v50  ;;  %v1544_v17 = vpop.f32.mrb[32].mxu1 }
 0xe80   :  { %v1559_v1 = vmul.f32 %v1498_v61, %v3096_v10  ;;  %v1553_v18 = vrot.slane %v1544_v17, 4  ;;  %v1546_v7 = vpop.f32.mrb[33].mxu1 }
 0xe81   :  { %v1560_v21 = vmul.f32 %v1499_v16, %v3100_v32  ;;  %v1554_v2 = vrot.slane %v1546_v7, 4  ;;  %v1548_v19 = vpop.f32.mrb[34].mxu1  ;;  %v3598_v16 = vrot.slane %v2854_v30, 1 }
 0xe82   :  { %2449 = vtanh.f32 %v1559_v1  ;;  %v1557_v60 = vadd.f32 %v1553_v18, %v2821_v43  ;;  %v1549_v37 = vpop.f32.mrb[35].mxu1  ;;  %v1588_v19 = vrot.slane %v3289_v20, 1 }
 0xe83   :  { %2451 = vtanh.f32 %v1560_v21  ;;  %v1558_v12 = vadd.f32 %v1554_v2, %v2825_v46 }
 0xe84   :  { %v1579_v49 = vmul.f32 %v1557_v60, %v3089_v51 }
 0xe85   :  { %v1580_v50 = vmul.f32 %v1558_v12, %v3092_v56 }
 0xe86   :  { %2453 = vtanh.f32 %v1579_v49 }
 0xe87   :  { %2455 = vtanh.f32 %v1580_v50 }
 0xe8c   :  { %v2450_v15 = vpop.eup %2449 }
 0xe8d   :  { %v2452_v54 = vpop.eup %2451  ;;  %v1563_v47 = vmul.f32 %v2450_v15, %v3096_v10 }
 0xe8e   :  { %v1564_v26 = vmul.f32 %v2452_v54, %v3100_v32  ;;  %v3599_v32 = vrot.slane %v2854_v30, 4 }
 0xe8f   :  { %v1565_v61 = vadd.f32 %v1563_v47, %v3096_v10 }
 0xe90   :  { %v2454_v58 = vpop.eup %2453  ;;  %v1566_v17 = vadd.f32 %v1564_v26, %v3598_v16 }
 0xe91   :  { %v2456_v1 = vpop.eup %2455  ;;  %v1583_v18 = vmul.f32 %v2454_v58, %v3089_v51  ;;  %v1570_v7 = vmul.f32 %v1568_v13, %v1565_v61 }
 0xe92   :  { %v1571_v21 = vmul.f32 %v1566_v17, %v1565_v61  ;;  %v1584_v2 = vmul.f32 %v2456_v1, %v3092_v56 }
 0xe93   :  { %v1585_v60 = vadd.f32 %v1583_v18, %v3089_v51 }
 0xe94   :  { %1573 = vrot.lane.b32.xlu0 %v1571_v21, %s2647_s1  ;;  %v1586_v10 = vadd.f32 %v1584_v2, %v3599_v32 }
 0xe95   :  { %v1590_v28 = vmul.f32 %v1588_v19, %v1585_v60 }
 0xe96   :  { %v1591_v37 = vmul.f32 %v1586_v10, %v1585_v60 }
 0xe98   :  { %1593 = vrot.lane.b32.xlu1 %v1591_v37, %s2647_s1 }
 0xf06   :  { %v1574_v12 = vpop.permute.xlu0 %1573 }
 0xf07   :  { %v3344_v49 = vadd.f32 %v1574_v12, %v1570_v7 }
 0xf09   :  { %2457 = vtanh.f32 %v3344_v49 }
 0xf0a   :  { %v1594_v50 = vpop.permute.xlu1 %1593 }
 0xf0b   :  { %v3347_v56 = vadd.f32 %v1594_v50, %v1590_v28 }
 0xf0d   :  { %2459 = vtanh.f32 %v3347_v56 }
 0xf13   :  { %v2458_v51 = vpop.eup %2457 }
 0xf14   :  { %v1578_v20 = vmul.f32 %v2458_v51, %v1566_v17 }
 0xf16   :  { %v1599_v15 = vpack.c.bf16 %v1578_v20, %v1578_v20  ;;  %v3352_v54 = vsel %vm2220_vm8, %v3296_v0, %v1578_v20 }
 0xf17   :  { %v2460_v47 = vpop.eup %2459 }
 0xf18   :  { %v1601_v26 = vshrl.u32 %v1599_v15, 16  ;;  %v3354_v13 = vmul.f32 %v2460_v47, %v1586_v10 }
 0xf1a   :  { %v1603_v61 = vrot.slane %v1601_v26, 3  ;;  %v1652_v58 = vpack.c.bf16 %v3354_v13, %v3354_v13 }
 0xf1c   :  { %1604 = vrot.lane.b32.xlu0 %v1603_v61, %s2647_s1  ;;  %v1654_v16 = vrot.slane %v1652_v58, 2 }
 0xf1e   :  { %1655 = vrot.lane.b32.xlu1 %v1654_v16, %s2647_s1 }
 0xf8e   :  { %v1605_v1 = vpop.permute.xlu0 %1604 }
 0xf8f   :  { %2307 = vmatmul.mubr.msk.bf16.vlgmr.msra.gmra.mrb[36].mxu0 %vm260_vm1, %v1605_v1 }
 0xf90   :  { %v1656_v17 = vpop.permute.xlu1 %1655  ;;  %1757 = vmatpush1.bf16.msra.mxu0 %v3219_v23  ;;  %1788 = vmatprep.mubr.bf16.mxu0 %v3597_v22 }
 0xf91   :  { %2308 = vmatmul.mubr.msk.bf16.vlgmr.msra.gmra.mrb[36].mxu1 %vm260_vm1, %v1656_v17  ;;  %1758 = vmatprep.subr.bf16.mxu0 %v3224_v9  ;;  %v1718_v17 = vrot.slane %v3344_v49, 7 }
 0xf92   :  { %1816 = vmatpush1.bf16.msra.mxu1 %v3145_v8  ;;  %1847 = vmatprep.mubr.bf16.mxu1 %v3597_v22 }
 0xf93   :  { %1817 = vmatprep.subr.bf16.mxu1 %v3229_v24 }
 0xf94   :  { %1759 = vmatpush1.bf16.msra.mxu0 %v3232_v25 }
 0xf95   :  { %1760 = vmatprep.subr.bf16.mxu0 %v3235_v53 }
 0xf96   :  { %1818 = vmatpush1.bf16.msra.mxu1 %v3238_v38 }
 0xf97   :  { %1819 = vmatprep.subr.bf16.mxu1 %v3241_v59 }
 0xf98   :  { %1761 = vmatpush1.bf16.msra.mxu0 %v3244_v57 }
 0xf99   :  { %1762 = vmatprep.subr.bf16.mxu0 %v3247_v29 }
 0xf9a   :  { %1820 = vmatpush1.bf16.msra.mxu1 %v3250_v52 }
 0xf9b   :  { %1821 = vmatprep.subr.bf16.mxu1 %v3253_v33 }
 0xf9c   :  { %1763 = vmatpush1.bf16.msra.mxu0 %v3256_v62 }
 0xf9d   :  { %1913 = vmatprep.subr.bf16.mxu0 %v3159_v11 }
 0xf9e   :  { %1822 = vmatpush1.bf16.msra.mxu1 %v3260_v35 }
 0xf9f   :  { %1970 = vmatprep.subr.bf16.mxu1 %v3163_v14 }
0x1062   :  { %v1643_v0 = vpop.f32.mrb[36].mxu0 }
0x1063   :  { %v1650_v18 = vadd.f32 %v1643_v0, %v2819_v41  ;;  %v1645_v7 = vpop.f32.mrb[37].mxu0 }
0x1064   :  { %v1651_v21 = vadd.f32 %v1645_v7, %v2823_v45  ;;  %v1647_v2 = vpop.f32.mrb[38].mxu0  ;;  %v1694_v19 = vpop.f32.mrb[36].mxu1 }
0x1065   :  { %v1709_v60 = vmul.f32 0.5, %v1650_v18  ;;  %v1703_v32 = vrot.slane %v1694_v19, 5  ;;  %v1648_v10 = vpop.f32.mrb[39].mxu0  ;;  %v1696_v28 = vpop.f32.mrb[37].mxu1 }
0x1066   :  { %v1710_v37 = vmul.f32 %v1651_v21, %v2836_v55  ;;  %v1704_v12 = vrot.slane %v1696_v28, 5  ;;  %v1698_v50 = vpop.f32.mrb[38].mxu1  ;;  %v1738_v10 = vrot.slane %v3347_v56, 1 }
0x1067   :  { %2461 = vtanh.f32 %v1709_v60  ;;  %v1707_v51 = vadd.f32 %v1703_v32, %v2821_v43  ;;  %v1699_v20 = vpop.f32.mrb[39].mxu1 }
0x1068   :  { %2463 = vtanh.f32 %v1710_v37  ;;  %v1708_v15 = vadd.f32 %v1704_v12, %v2825_v46 }
0x1069   :  { %v1729_v47 = vmul.f32 %v1707_v51, %v2842_v63 }
0x106a   :  { %v1730_v26 = vmul.f32 %v1708_v15, %v2846_v5 }
0x106b   :  { %2465 = vtanh.f32 %v1729_v47 }
0x106c   :  { %2467 = vtanh.f32 %v1730_v26 }
0x1071   :  { %v2462_v61 = vpop.eup %2461 }
0x1072   :  { %v2464_v58 = vpop.eup %2463  ;;  %v1713_v16 = vmul.f32 0.5, %v2462_v61 }
0x1073   :  { %v1714_v1 = vmul.f32 %v2464_v58, %v2836_v55 }
0x1074   :  { %v1715_v0 = vadd.f32 0.5, %v1713_v16 }
0x1075   :  { %v2466_v18 = vpop.eup %2465  ;;  %v1716_v7 = vadd.f32 %v1714_v1, %v2854_v30 }
0x1076   :  { %v2468_v21 = vpop.eup %2467  ;;  %v1733_v2 = vmul.f32 %v2466_v18, %v2842_v63  ;;  %v1720_v19 = vmul.f32 %v1718_v17, %v1715_v0 }
0x1077   :  { %v1721_v60 = vmul.f32 %v1716_v7, %v1715_v0  ;;  %v1734_v32 = vmul.f32 %v2468_v21, %v2846_v5 }
0x1078   :  { %v1735_v28 = vadd.f32 %v1733_v2, %v2842_v63 }
0x1079   :  { %1723 = vrot.lane.b32.xlu0 %v1721_v60, %s2647_s1  ;;  %v1736_v37 = vadd.f32 %v1734_v32, %v2859_v36 }
0x107a   :  { %v1740_v49 = vmul.f32 %v1738_v10, %v1735_v28 }
0x107b   :  { %v1741_v12 = vmul.f32 %v1736_v37, %v1735_v28 }
0x107d   :  { %1743 = vrot.lane.b32.xlu1 %v1741_v12, %s2647_s1 }
0x10eb   :  { %v1724_v50 = vpop.permute.xlu0 %1723 }
0x10ec   :  { %v3397_v51 = vadd.f32 %v1724_v50, %v1720_v19 }
0x10ee   :  { %2469 = vtanh.f32 %v3397_v51 }
0x10ef   :  { %v1744_v20 = vpop.permute.xlu1 %1743 }
0x10f0   :  { %v3400_v15 = vadd.f32 %v1744_v20, %v1740_v49 }
0x10f2   :  { %2471 = vtanh.f32 %v3400_v15 }
0x10f8   :  { %v2470_v56 = vpop.eup %2469 }
0x10f9   :  { %v3403_v47 = vmul.f32 %v2470_v56, %v1716_v7 }
0x10fb   :  { %v1749_v26 = vpack.c.bf16 %v3403_v47, %v3403_v47 }
0x10fc   :  { %v2472_v61 = vpop.eup %2471 }
0x10fd   :  { %1751 = vrot.lane.b32.xlu0 %v1749_v26, %s2647_s1  ;;  %v3408_v58 = vmul.f32 %v2472_v61, %v1736_v37 }
0x10ff   :  { %v1805_v16 = vpack.c.bf16 %v3408_v58, %v3408_v58 }
0x1101   :  { %v1807_v1 = vshrl.u32 %v1805_v16, 16 }
0x1103   :  { %v1809_v17 = vrot.slane %v1807_v1, 1 }
0x1105   :  { %1810 = vrot.lane.b32.xlu1 %v1809_v17, %s2647_s1 }
0x116f   :  { %v1752_v0 = vpop.permute.xlu0 %1751 }
0x1170   :  { %2309 = vmatmul.mubr.msk.bf16.vlgmr.msra.gmra.mrb[40].mxu0 %vm260_vm1, %v1752_v0 }
0x1171   :  { %1914 = vmatpush1.bf16.msra.mxu0 %v3219_v23  ;;  %1945 = vmatprep.mubr.bf16.mxu0 %v3597_v22 }
0x1172   :  { %1915 = vmatprep.subr.bf16.mxu0 %v3224_v9 }
0x1175   :  { %1916 = vmatpush1.bf16.msra.mxu0 %v3232_v25 }
0x1176   :  { %1917 = vmatprep.subr.bf16.mxu0 %v3235_v53 }
0x1177   :  { %v1811_v18 = vpop.permute.xlu1 %1810 }
0x1178   :  { %2310 = vmatmul.mubr.msk.bf16.vlgmr.msra.gmra.mrb[40].mxu1 %vm260_vm1, %v1811_v18 }
0x1179   :  { %1918 = vmatpush1.bf16.msra.mxu0 %v3244_v57  ;;  %1971 = vmatpush1.bf16.msra.mxu1 %v3145_v8 }
0x117a   :  { %1919 = vmatprep.subr.bf16.mxu0 %v3247_v29  ;;  %1972 = vmatprep.subr.bf16.mxu1 %v3229_v24 }
0x117b   :  { %2002 = vmatprep.mubr.bf16.mxu1 %v3597_v22 }
0x117d   :  { %1920 = vmatpush1.bf16.msra.mxu0 %v3256_v62  ;;  %1973 = vmatpush1.bf16.msra.mxu1 %v3238_v38 }
0x117e   :  { %1974 = vmatprep.subr.bf16.mxu1 %v3241_v59  ;;  %2067 = vmatprep.subr.bf16.mxu0 %v3159_v11 }
0x1181   :  { %1975 = vmatpush1.bf16.msra.mxu1 %v3250_v52 }
0x1182   :  { %1976 = vmatprep.subr.bf16.mxu1 %v3253_v33 }
0x1185   :  { %1977 = vmatpush1.bf16.msra.mxu1 %v3260_v35 }
0x1186   :  { %2125 = vmatprep.subr.bf16.mxu1 %v3163_v14 }
0x1243   :  { %v1790_v7 = vpop.f32.mrb[40].mxu0 }
0x1244   :  { %v1799_v21 = vrot.slane %v1790_v7, 7  ;;  %v1792_v2 = vpop.f32.mrb[41].mxu0 }
0x1245   :  { %v1800_v19 = vrot.slane %v1792_v2, 7  ;;  %v1794_v60 = vpop.f32.mrb[42].mxu0 }
0x1246   :  { %v1803_v32 = vadd.f32 %v1799_v21, %v2819_v41  ;;  %v1795_v10 = vpop.f32.mrb[43].mxu0  ;;  %v1873_v21 = vrot.slane %v3397_v51, 7 }
0x1247   :  { %v1804_v28 = vadd.f32 %v1800_v19, %v2823_v45 }
0x1248   :  { %v1864_v11 = vmul.f32 %v1803_v32, %v2904_v27 }
0x1249   :  { %v1865_v37 = vmul.f32 %v1804_v28, %v2907_v31 }
0x124a   :  { %2473 = vtanh.f32 %v1864_v11 }
0x124b   :  { %2475 = vtanh.f32 %v1865_v37  ;;  %v1849_v49 = vpop.f32.mrb[40].mxu1 }
0x124c   :  { %v1858_v12 = vrot.slane %v1849_v49, 6  ;;  %v1851_v50 = vpop.f32.mrb[41].mxu1  ;;  %v1893_v49 = vrot.slane %v3400_v15, 1 }
0x124d   :  { %v1859_v14 = vrot.slane %v1851_v50, 6  ;;  %v1853_v20 = vpop.f32.mrb[42].mxu1 }
0x124e   :  { %v1862_v56 = vadd.f32 %v1858_v12, %v2821_v43  ;;  %v1854_v26 = vpop.f32.mrb[43].mxu1 }
0x124f   :  { %v1863_v61 = vadd.f32 %v1859_v14, %v2825_v46 }
0x1250   :  { %v1884_v16 = vmul.f32 %v1862_v56, %v2914_v42 }
0x1251   :  { %v1885_v1 = vmul.f32 %v1863_v61, %v2917_v48 }
0x1252   :  { %2477 = vtanh.f32 %v1884_v16 }
0x1253   :  { %2479 = vtanh.f32 %v1885_v1 }
0x1254   :  { %v2474_v17 = vpop.eup %2473 }
0x1255   :  { %v2476_v0 = vpop.eup %2475  ;;  %v1868_v18 = vmul.f32 %v2474_v17, %v2904_v27 }
0x1256   :  { %v1869_v7 = vmul.f32 %v2476_v0, %v2907_v31 }
0x1257   :  { %v1870_v2 = vadd.f32 %v1868_v18, %v2904_v27 }
0x1258   :  { %v1871_v19 = vadd.f32 %v1869_v7, %v2924_v4 }
0x1259   :  { %v1875_v60 = vmul.f32 %v1873_v21, %v1870_v2 }
0x125a   :  { %v1876_v32 = vmul.f32 %v1871_v19, %v1870_v2 }
0x125c   :  { %v2478_v10 = vpop.eup %2477  ;;  %1878 = vrot.lane.b32.xlu0 %v1876_v32, %s2647_s1 }
0x125d   :  { %v2480_v28 = vpop.eup %2479  ;;  %v1888_v11 = vmul.f32 %v2478_v10, %v2914_v42 }
0x125e   :  { %v1889_v37 = vmul.f32 %v2480_v28, %v2917_v48 }
0x125f   :  { %v1890_v12 = vadd.f32 %v1888_v11, %v2914_v42 }
0x1260   :  { %v1891_v51 = vadd.f32 %v1889_v37, %v2933_v34 }
0x1261   :  { %v1895_v50 = vmul.f32 %v1893_v49, %v1890_v12 }
0x1262   :  { %v1896_v14 = vmul.f32 %v1891_v51, %v1890_v12 }
0x1264   :  { %1898 = vrot.lane.b32.xlu1 %v1896_v14, %s2647_s1 }
0x12ce   :  { %v1879_v20 = vpop.permute.xlu0 %1878 }
0x12cf   :  { %v3453_v56 = vadd.f32 %v1879_v20, %v1875_v60 }
0x12d1   :  { %2481 = vtanh.f32 %v3453_v56 }
0x12d6   :  { %v1899_v26 = vpop.permute.xlu1 %1898 }
0x12d7   :  { %v3456_v61 = vadd.f32 %v1899_v26, %v1895_v50  ;;  %v2028_v50 = vrot.slane %v3453_v56, 7 }
0x12d9   :  { %2483 = vtanh.f32 %v3456_v61 }
0x12db   :  { %v2482_v16 = vpop.eup %2481 }
0x12dc   :  { %v3459_v15 = vmul.f32 %v2482_v16, %v1871_v19 }
0x12de   :  { %v1904_v1 = vpack.c.bf16 %v3459_v15, %v3459_v15 }
0x12e0   :  { %v1906_v17 = vshrl.u32 %v1904_v1, 16 }
0x12e2   :  { %1908 = vrot.lane.b32.xlu0 %v1906_v17, %s2647_s1 }
0x12e3   :  { %v2484_v0 = vpop.eup %2483 }
0x12e4   :  { %v3464_v18 = vmul.f32 %v2484_v0, %v1891_v51 }
0x12e6   :  { %v1962_v7 = vpack.c.bf16 %v3464_v18, %v3464_v18 }
0x12e8   :  { %v1964_v21 = vrot.slane %v1962_v7, 1 }
0x12ea   :  { %1965 = vrot.lane.b32.xlu1 %v1964_v21, %s2647_s1  ;;  %v2048_v21 = vrot.slane %v3456_v61, 1 }
0x1354   :  { %v1909_v2 = vpop.permute.xlu0 %1908 }
0x1355   :  { %2311 = vmatmul.mubr.msk.bf16.vlgmr.msra.gmra.mrb[44].mxu0 %vm260_vm1, %v1909_v2 }
0x1356   :  { %2068 = vmatpush1.bf16.msra.mxu0 %v3219_v23  ;;  %2099 = vmatprep.mubr.bf16.mxu0 %v3597_v22 }
0x1357   :  { %2069 = vmatprep.subr.bf16.mxu0 %v3224_v9 }
0x135a   :  { %2070 = vmatpush1.bf16.msra.mxu0 %v3232_v25 }
0x135b   :  { %2071 = vmatprep.subr.bf16.mxu0 %v3235_v53 }
0x135c   :  { %v1966_v19 = vpop.permute.xlu1 %1965 }
0x135d   :  { %2312 = vmatmul.mubr.msk.bf16.vlgmr.msra.gmra.mrb[44].mxu1 %vm260_vm1, %v1966_v19 }
0x135e   :  { %2072 = vmatpush1.bf16.msra.mxu0 %v3244_v57  ;;  %2126 = vmatpush1.bf16.msra.mxu1 %v3145_v8 }
0x135f   :  { %2073 = vmatprep.subr.bf16.mxu0 %v3247_v29  ;;  %2127 = vmatprep.subr.bf16.mxu1 %v3229_v24 }
0x1360   :  { %2157 = vmatprep.mubr.bf16.mxu1 %v3597_v22 }
0x1362   :  { %2074 = vmatpush1.bf16.msra.mxu0 %v3256_v62  ;;  %2128 = vmatpush1.bf16.msra.mxu1 %v3238_v38 }
0x1363   :  { %2129 = vmatprep.subr.bf16.mxu1 %v3241_v59 }
0x1366   :  { %2130 = vmatpush1.bf16.msra.mxu1 %v3250_v52 }
0x1367   :  { %2131 = vmatprep.subr.bf16.mxu1 %v3253_v33 }
0x136a   :  { %2132 = vmatpush1.bf16.msra.mxu1 %v3260_v35 }
0x1428   :  { %v1947_v23 = vpop.f32.mrb[44].mxu0 }
0x1429   :  { %v1956_v8 = vrot.slane %v1947_v23, 6  ;;  %v1949_v9 = vpop.f32.mrb[45].mxu0 }
0x142a   :  { %v1957_v25 = vrot.slane %v1949_v9, 6  ;;  %v1951_v53 = vpop.f32.mrb[46].mxu0 }
0x142b   :  { %v1960_v24 = vadd.f32 %v1956_v8, %v2819_v41  ;;  %v1952_v57 = vpop.f32.mrb[47].mxu0 }
0x142c   :  { %v1961_v29 = vadd.f32 %v1957_v25, %v2823_v45 }
0x142d   :  { %v2019_v38 = vmul.f32 %v1960_v24, %v2914_v42 }
0x142e   :  { %v2020_v59 = vmul.f32 %v1961_v29, %v2917_v48 }
0x142f   :  { %2485 = vtanh.f32 %v2019_v38 }
0x1430   :  { %2487 = vtanh.f32 %v2020_v59  ;;  %v2004_v52 = vpop.f32.mrb[44].mxu1 }
0x1431   :  { %v2013_v33 = vrot.slane %v2004_v52, 7  ;;  %v2006_v62 = vpop.f32.mrb[45].mxu1 }
0x1432   :  { %v2014_v35 = vrot.slane %v2006_v62, 7  ;;  %v2008_v22 = vpop.f32.mrb[46].mxu1 }
0x1433   :  { %v2017_v60 = vadd.f32 %v2013_v33, %v2821_v43  ;;  %v2009_v32 = vpop.f32.mrb[47].mxu1 }
0x1434   :  { %v2018_v10 = vadd.f32 %v2014_v35, %v2825_v46 }
0x1435   :  { %v2039_v28 = vmul.f32 %v2017_v60, %v2904_v27 }
0x1436   :  { %v2040_v11 = vmul.f32 %v2018_v10, %v2907_v31 }
0x1437   :  { %2489 = vtanh.f32 %v2039_v28 }
0x1438   :  { %2491 = vtanh.f32 %v2040_v11 }
0x1439   :  { %v2486_v37 = vpop.eup %2485 }
0x143a   :  { %v2488_v49 = vpop.eup %2487  ;;  %v2023_v12 = vmul.f32 %v2486_v37, %v2914_v42 }
0x143b   :  { %v2024_v51 = vmul.f32 %v2488_v49, %v2917_v48 }
0x143c   :  { %v2025_v14 = vadd.f32 %v2023_v12, %v2914_v42 }
0x143d   :  { %v2026_v20 = vadd.f32 %v2024_v51, %v2933_v34 }
0x143e   :  { %v2030_v26 = vmul.f32 %v2028_v50, %v2025_v14 }
0x143f   :  { %v2031_v16 = vmul.f32 %v2026_v20, %v2025_v14 }
0x1441   :  { %v2490_v1 = vpop.eup %2489  ;;  %2033 = vrot.lane.b32.xlu0 %v2031_v16, %s2647_s1 }
0x1442   :  { %v2492_v17 = vpop.eup %2491  ;;  %v2043_v0 = vmul.f32 %v2490_v1, %v2904_v27 }
0x1443   :  { %v2044_v7 = vmul.f32 %v2492_v17, %v2907_v31  ;;  %v2222_v31 = vsel %vm2208_vm2, %v3403_v47, %v3459_v15 }
0x1444   :  { %v2045_v48 = vadd.f32 %v2043_v0, %v2904_v27 }
0x1445   :  { %v2046_v56 = vadd.f32 %v2044_v7, %v2924_v4 }
0x1446   :  { %v2050_v2 = vmul.f32 %v2048_v21, %v2045_v48 }
0x1447   :  { %v2051_v42 = vmul.f32 %v2046_v56, %v2045_v48 }
0x1449   :  { %2053 = vrot.lane.b32.xlu1 %v2051_v42, %s2647_s1 }
0x14b3   :  { %v2034_v34 = vpop.permute.xlu0 %2033 }
0x14b4   :  { %v2036_v19 = vadd.f32 %v2034_v34, %v2030_v26 }
0x14b6   :  { %2493 = vtanh.f32 %v2036_v19  ;;  %v2177_v16 = vrot.slane %v2036_v19, 7 }
0x14bb   :  { %v2054_v23 = vpop.permute.xlu1 %2053 }
0x14bc   :  { %v2056_v8 = vadd.f32 %v2054_v23, %v2050_v2 }
0x14be   :  { %2495 = vtanh.f32 %v2056_v8 }
0x14c0   :  { %v2494_v9 = vpop.eup %2493 }
0x14c1   :  { %v2038_v25 = vmul.f32 %v2494_v9, %v2026_v20 }
0x14c3   :  { %v2059_v61 = vpack.c.bf16 %v2038_v25, %v2038_v25  ;;  %v3511_v27 = vsel %vm2210_vm3, %v2222_v31, %v2038_v25 }
0x14c5   :  { %v2061_v4 = vrot.slane %v2059_v61, 1 }
0x14c7   :  { %2062 = vrot.lane.b32.xlu0 %v2061_v4, %s2647_s1 }
0x14c8   :  { %v2496_v53 = vpop.eup %2495 }
0x14c9   :  { %v3514_v24 = vmul.f32 %v2496_v53, %v2046_v56  ;;  %v2197_v56 = vrot.slane %v2056_v8, 1 }
0x14cb   :  { %v2116_v57 = vpack.c.bf16 %v3514_v24, %v3514_v24 }
0x14cd   :  { %v2118_v29 = vshrl.u32 %v2116_v57, 16 }
0x14cf   :  { %2120 = vrot.lane.b32.xlu1 %v2118_v29, %s2647_s1 }
0x1539   :  { %v2063_v38 = vpop.permute.xlu0 %2062 }
0x153a   :  { %2313 = vmatmul.mubr.msk.bf16.vlgmr.msra.gmra.mrb[48].mxu0 %vm260_vm1, %v2063_v38 }
0x1541   :  { %v2121_v47 = vpop.permute.xlu1 %2120 }
0x1542   :  { %2314 = vmatmul.mubr.msk.bf16.vlgmr.msra.gmra.mrb[48].mxu1 %vm260_vm1, %v2121_v47 }
0x160d   :  { %v2101_v15 = vpop.f32.mrb[48].mxu0 }
0x160e   :  { %v2110_v59 = vrot.slane %v2101_v15, 5  ;;  %v2103_v52 = vpop.f32.mrb[49].mxu0 }
0x160f   :  { %v2111_v33 = vrot.slane %v2103_v52, 5  ;;  %v2105_v62 = vpop.f32.mrb[50].mxu0 }
0x1610   :  { %v2114_v35 = vadd.f32 %v2110_v59, %v2819_v41  ;;  %v2106_v22 = vpop.f32.mrb[51].mxu0 }
0x1611   :  { %v2115_v60 = vadd.f32 %v2111_v33, %v2823_v45 }
0x1612   :  { %v2168_v32 = vmul.f32 %v2114_v35, %v2842_v63 }
0x1613   :  { %v2169_v10 = vmul.f32 %v2115_v60, %v2846_v5 }
0x1614   :  { %2497 = vtanh.f32 %v2168_v32 }
0x1615   :  { %2499 = vtanh.f32 %v2169_v10  ;;  %v2159_v28 = vpop.f32.mrb[48].mxu1 }
0x1616   :  { %v2166_v11 = vadd.f32 %v2159_v28, %v2821_v43  ;;  %v2161_v37 = vpop.f32.mrb[49].mxu1 }
0x1617   :  { %v2167_v49 = vadd.f32 %v2161_v37, %v2825_v46  ;;  %v2163_v12 = vpop.f32.mrb[50].mxu1 }
0x1618   :  { %v2188_v51 = vmul.f32 0.5, %v2166_v11  ;;  %v2164_v50 = vpop.f32.mrb[51].mxu1 }
0x1619   :  { %v2189_v41 = vmul.f32 %v2167_v49, %v2836_v55 }
0x161a   :  { %2501 = vtanh.f32 %v2188_v51 }
0x161b   :  { %2503 = vtanh.f32 %v2189_v41 }
0x161e   :  { %v2498_v45 = vpop.eup %2497 }
0x161f   :  { %v2500_v14 = vpop.eup %2499  ;;  %v2172_v20 = vmul.f32 %v2498_v45, %v2842_v63 }
0x1620   :  { %v2173_v26 = vmul.f32 %v2500_v14, %v2846_v5 }
0x1621   :  { %v2174_v1 = vadd.f32 %v2172_v20, %v2842_v63 }
0x1622   :  { %v2175_v43 = vadd.f32 %v2173_v26, %v2859_v36 }
0x1623   :  { %v2179_v17 = vmul.f32 %v2177_v16, %v2174_v1 }
0x1624   :  { %v2502_v46 = vpop.eup %2501  ;;  %v2180_v0 = vmul.f32 %v2175_v43, %v2174_v1 }
0x1625   :  { %v2504_v7 = vpop.eup %2503  ;;  %v2192_v21 = vmul.f32 0.5, %v2502_v46 }
0x1626   :  { %2182 = vrot.lane.b32.xlu0 %v2180_v0, %s2647_s1  ;;  %v2193_v48 = vmul.f32 %v2504_v7, %v2836_v55 }
0x1627   :  { %v2194_v2 = vadd.f32 0.5, %v2192_v21 }
0x1628   :  { %v2195_v42 = vadd.f32 %v2193_v48, %v2854_v30 }
0x1629   :  { %v2199_v34 = vmul.f32 %v2197_v56, %v2194_v2 }
0x162a   :  { %2237 = vrot.lane.b32.xlu0 %v3352_v54, %s2647_s1  ;;  %v2200_v63 = vmul.f32 %v2195_v42, %v2194_v2 }
0x162c   :  { %2202 = vrot.lane.b32.xlu1 %v2200_v63, %s2647_s1 }
0x1698   :  { %v2183_v5 = vpop.permute.xlu0 %2182 }
0x1699   :  { %v2185_v36 = vadd.f32 %v2183_v5, %v2179_v17 }
0x169b   :  { %2505 = vtanh.f32 %v2185_v36 }
0x169c   :  { %v2238_v57 = vpop.permute.xlu0 %2237 }
0x169e   :  { %v2203_v19 = vpop.permute.xlu1 %2202 }
0x169f   :  { %v2205_v23 = vadd.f32 %v2203_v19, %v2199_v34 }
0x16a1   :  { %2507 = vtanh.f32 %v2205_v23 }
0x16a5   :  { %v2506_v9 = vpop.eup %2505 }
0x16a6   :  { %v2187_v25 = vmul.f32 %v2506_v9, %v2175_v43 }
0x16a8   :  { %v2224_v55 = vsel %vm2212_vm4, %v3511_v27, %v2187_v25 }
0x16a9   :  { %2239 = vrot.lane.b32.xlu1 %v2224_v55, %s2647_s1  ;;  %s2252_s1 = sshll.u32 %s2655_s4, 4  ;;  %s2253_s1 = int_to_ptr.vmem [resolvable:$true] %s2252_s1 }
0x16aa   :  { %s2613_s20 = scalar_lea.vmem %s2253_s1, 256  ;;  %p2618_p5 = scmp.lt.s32.totalorder %s2253_s1, %s2253_s1 }
0x16ab   :  { %v2508_v30 = vpop.eup %2507  ;;  %p2614_p4 = scmp.ne.s32.totalorder %s2253_s1, %s2613_s20  ;;  %p2619_p6 = scmp.lt.s32.totalorder %s2613_s20, %s2613_s20 }
0x16ac   :  { %v2207_v8 = vmul.f32 %v2508_v30, %v2195_v42 }
0x16ad   :  { %p2620_p7 = por %p2619_p6, %p2618_p5 }
0x16ae   :  { %v2225_v54 = vsel %vm2208_vm2, %v2207_v8, %v3514_v24 }
0x16af   :  { %v2226_v31 = vsel %vm2210_vm3, %v2225_v54, %v3464_v18  ;;  %v3600_v18 = vld [vmem:[#allocation16_spill] sm:$0xff]  ;;  %p2621_p8 = pnand %p2620_p7, %p2614_p4 }
0x16b0   :  { %v2227_v61 = vsel %vm2212_vm4, %v2226_v31, %v3408_v58  ;;  %v2232_v58 = vsel %vm2208_vm2, %v3062_v44, %v3010_v39 }
0x16b1   :  { %v2228_v4 = vsel %vm2214_vm5, %v2227_v61, %v3354_v13  ;;  %v2233_v13 = vsel %vm2210_vm3, %v2232_v58, %v3600_v18 }
0x16b2   :  { %v2229_v53 = vsel %vm2216_vm6, %v2228_v4, %v3292_v3  ;;  %v3601_v3 = vld [vmem:[#allocation15_spill] sm:$0xff] }
0x16b3   :  { %v2230_v27 = vsel %vm2218_vm7, %v2229_v53, %v3212_v40  ;;  %v2234_v38 = vsel %vm2212_vm4, %v2233_v13, %v3601_v3 }
0x16b4   :  { %v2231_v29 = vsel %vm2220_vm8, %v2230_v27, %v3130_v6 }
0x16b5   :  { %v2243_v24 = vsel %vm260_vm1, %v2238_v57, %v2231_v29 }
0x16b6   :  { %2245 = vst [vmem:[#allocation10] sm:$0xff] %v2243_v24 }
0x171b   :  { %v2240_v40 = vpop.permute.xlu1 %2239 }
0x171c   :  { %v2244_v47 = vsel %vm260_vm1, %v2240_v40, %v2234_v38 }
0x171d   :  { %2246 = vst [vmem:[#allocation10 + $0x8] sm:$0xf] %v2244_v47 }
0x171e   :  { %2624 = shalt.err (!%p2621_p8)
}
0x171f   :  { %s2625_s23 = scalar_lea.hbm %s3584_s5, 256 }
0x1720   :  { %p2626_p9 = scmp.ne.s32.totalorder %s3584_s5, %s2625_s23  ;;  %p2629_p10 = scmp.lt.u32.totalorder %s2625_s23, %s3584_s5 }
0x1722   :  { %p2631_p11 = pnand %p2629_p10, %p2626_p9 }
0x1724   :  { %2634 = shalt.err (!%p2631_p11)
}
0x1725   :  { %2258 = dma.vmem_to_hbm [thread:$0]  %s2253_s1, 256, %s3584_s5, [#allocation4], %s2650_s0, %s2650_s0, %s2651_s30  }
0x1726   :  { %2641 = dma.done.wait [#allocation4], 256  }
0x1727   :  { %2642 = vsyncadd [#allocation4], 4294967040 }
0x1728   :  { %2262 = vsyncpa [#allocation3], 1 }
0x1729   :  { %2263 = vsyncpa [#allocation6], 1 }
0x172a   :  { %2264 = vsyncpa [#allocation9], 1 }
0x172b   :  { %2265 = vsyncpa [#allocation4], 1 }

</bundles_post_ra>
